<compile_context>
chip_gen: v6e
topology: v6e:2x2x1
jax: 0.10.0
libtpu: 0.0.40
codegen_flags: <defaults>
</compile_context>

<pallas_src>
import functools

import jax
import jax.numpy as jnp
from jax.experimental import pallas as pl
from jax.experimental.pallas import tpu as pltpu

IN_CH, HID = 7, 6                       # ChebConv(7->6), then 6->6, 6->6, K=2
NODES_PER_GRAPH = 7                     # fc1 = Linear(42, 16) => 7 nodes * 6 ch / graph
FC_OUT = 16
BN_EPS = 1e-5

GRAPHS_PER_TILE = 8                                  # graphs per 56-row block
TILE_NODES = GRAPHS_PER_TILE * NODES_PER_GRAPH       # 56 rows (multiple of 8)
MAX_BLOCKS_PER_STEP = 16                             # 56-row blocks per grid step

# Every edge must stay inside its 56-row tile: graphs are contiguous runs of
# NODES_PER_GRAPH nodes and NODES_PER_GRAPH must divide TILE_NODES, otherwise
# the `src % TILE_NODES` column index below would be wrong.
assert TILE_NODES % NODES_PER_GRAPH == 0
assert TILE_NODES % 8 == 0


def _cdiv(a, b):
    return -(-a // b)


def chebnet_step_kernel(s_ref, x_ref, wcat_ref, vcat_ref, sel_ref, fcw_ref,
                        o_ref, *, blocks):
    """One grid step = `blocks` x (8 graphs): 3x (ChebConv K=2 + relu + BN) + residuals + FC."""
    # Unpack the packed constant slabs once (VMEM-resident, loaded per step).
    wcat = wcat_ref[...]                         # [48, HID] f32, 8-row slots
    w1_0 = wcat[0:IN_CH, :]
    w1_1 = wcat[8:8 + IN_CH, :]
    w2_0 = wcat[16:16 + HID, :]
    w2_1 = wcat[24:24 + HID, :]
    w3_0 = wcat[32:32 + HID, :]
    w3_1 = wcat[40:40 + HID, :]

    vcat = vcat_ref[...]                         # [8, FC_OUT] f32
    b1 = vcat[0:1, :HID]
    b2 = vcat[1:2, :HID]
    b3 = vcat[2:3, :HID]
    scale = vcat[3:4, :HID]                      # eval-BN scale
    shift = vcat[4:5, :HID]                      # eval-BN shift
    fcb = vcat[5:6, :]                           # [1, FC_OUT]

    # Static unrolled loop over the 56-row sub-blocks of this step.
    for blk in range(blocks):
        rows = pl.ds(blk * TILE_NODES, TILE_NODES)
        S = s_ref[rows, :].astype(jnp.float32)   # [T, T] block-diag scaled Laplacian
        x = x_ref[rows, :].astype(jnp.float32)   # [T, IN_CH]

        def stage(h, w0, w1, bias):
            # ChebConv K=2: z = T0(h) @ W0 + T1(h) @ W1 + b,  T0 = h, T1 = S @ h
            sh = jnp.dot(S, h, preferred_element_type=jnp.float32)
            z = (jnp.dot(h, w0, preferred_element_type=jnp.float32)
                 + jnp.dot(sh, w1, preferred_element_type=jnp.float32)
                 + bias)
            # relu then shared BatchNorm1d(6) in eval mode (folded to scale/shift)
            return jnp.maximum(z, 0.0) * scale + shift

        h1 = stage(x, w1_0, w1_1, b1)
        # F.dropout(p=0.5, training=False) == identity
        h2 = stage(h1, w2_0, w2_1, b2) + 0.7 * h1
        h3 = stage(h2, w3_0, w3_1, b3) + 0.7 * h2          # [T, HID]

        # Fused fc1: out[g, :] = sum_n h3[g*7 + n, :] @ Wfc[n] + b_fc
        # sel[n] is a constant [GB, T] 0/1 matrix selecting node n of every graph.
        acc = jnp.zeros((GRAPHS_PER_TILE, FC_OUT), jnp.float32)
        for n in range(NODES_PER_GRAPH):
            hn = jnp.dot(sel_ref[n], h3, preferred_element_type=jnp.float32)   # [GB, HID]
            acc = acc + jnp.dot(hn, fcw_ref[n], preferred_element_type=jnp.float32)
        o_ref[pl.ds(blk * GRAPHS_PER_TILE, GRAPHS_PER_TILE), :] = acc + fcb


def _build_tiled_operator(edge_index, edge_weight, n_pad):
    """Per-tile block-diagonal S = -D^{-1/2} W D^{-1/2}, stored as bf16 [n_pad, T].

    Mirrors torch_geometric ChebConv.__norm__('sym', lambda_max=2.0): the +1/-1
    diagonal terms cancel, leaving only the negated normalized adjacency.
    Messages norm * x[src] aggregate at dst = edge_index[1].  Graphs are contiguous
    blocks of 7 nodes, so every edge stays inside its 56-row tile.
    """
    src, dst = edge_index[0], edge_index[1]
    w = edge_weight.astype(jnp.float32)
    deg = jnp.zeros((n_pad,), jnp.float32).at[src].add(w)
    dinv = jnp.where(deg > 0, jax.lax.rsqrt(deg), 0.0)
    norm = -dinv[src] * w * dinv[dst]
    local_src = src % TILE_NODES                      # column index inside the tile
    s_tiles = jnp.zeros((n_pad, TILE_NODES), jnp.float32).at[dst, local_src].add(norm)
    return s_tiles.astype(jnp.bfloat16)               # halve the dominant HBM stream


@functools.partial(jax.jit, static_argnames=("num_graphs",))
def chebnet_wan_forward(params, x, edge_index, edge_attr, num_graphs):
    x = x.astype(jnp.float32)
    edge_attr = edge_attr.astype(jnp.float32)

    # --- static tiling arithmetic (num_graphs is a python int) -----------------
    nblocks_raw = _cdiv(num_graphs, GRAPHS_PER_TILE)
    # Large steps to amortize per-step overhead, but keep >=2 grid steps whenever
    # there is more than one block so v7x's second TensorCore gets work.
    blocks_per_step = max(1, min(MAX_BLOCKS_PER_STEP, _cdiv(nblocks_raw, 2)))
    nsteps = _cdiv(nblocks_raw, blocks_per_step)
    nblocks = nsteps * blocks_per_step
    g_pad = nblocks * GRAPHS_PER_TILE
    n_pad = g_pad * NODES_PER_GRAPH

    n = x.shape[0]
    x_pad = jnp.zeros((n_pad, IN_CH), jnp.bfloat16).at[:n, :].set(x.astype(jnp.bfloat16))
    s_tiles = _build_tiled_operator(edge_index, edge_attr, n_pad)

    # Fold eval-mode BatchNorm1d into per-channel scale / shift (parameter math).
    inv_std = jax.lax.rsqrt(params["bn_var"] + BN_EPS)
    bn_scale = params["bn_gamma"] * inv_std
    bn_shift = params["bn_beta"] - params["bn_mean"] * bn_scale

    # Pack the six conv weight matrices into one [48, HID] slab (8-row aligned slots).
    wcat = jnp.zeros((48, HID), jnp.float32)
    wcat = wcat.at[0:IN_CH, :].set(params["w1_0"])
    wcat = wcat.at[8:8 + IN_CH, :].set(params["w1_1"])
    wcat = wcat.at[16:16 + HID, :].set(params["w2_0"])
    wcat = wcat.at[24:24 + HID, :].set(params["w2_1"])
    wcat = wcat.at[32:32 + HID, :].set(params["w3_0"])
    wcat = wcat.at[40:40 + HID, :].set(params["w3_1"])

    # Pack biases / BN scale+shift / fc bias into one [8, FC_OUT] slab.
    vcat = jnp.zeros((8, FC_OUT), jnp.float32)
    vcat = vcat.at[0, :HID].set(params["b1"].reshape(HID))
    vcat = vcat.at[1, :HID].set(params["b2"].reshape(HID))
    vcat = vcat.at[2, :HID].set(params["b3"].reshape(HID))
    vcat = vcat.at[3, :HID].set(bn_scale)
    vcat = vcat.at[4, :HID].set(bn_shift)
    vcat = vcat.at[5, :].set(params["fc_b"])

    # Constant node-selection matrices: sel[n, g, t] = 1 iff t == g*7 + n.
    sel = (jnp.arange(TILE_NODES)[None, None, :]
           == (NODES_PER_GRAPH * jnp.arange(GRAPHS_PER_TILE)[None, :, None]
               + jnp.arange(NODES_PER_GRAPH)[:, None, None])).astype(jnp.float32)

    # fc1 weight (torch [16, 42]) -> per-node [7, HID, 16].
    fcw = params["fc_w"].T.reshape(NODES_PER_GRAPH, HID, FC_OUT)

    step_rows = blocks_per_step * TILE_NODES
    step_graphs = blocks_per_step * GRAPHS_PER_TILE

    grid_spec = pltpu.PrefetchScalarGridSpec(
        num_scalar_prefetch=0,
        grid=(nsteps,),
        in_specs=[
            pl.BlockSpec((step_rows, TILE_NODES), lambda t: (t, 0)),        # S slabs (bf16)
            pl.BlockSpec((step_rows, IN_CH), lambda t: (t, 0)),             # x (bf16)
            pl.BlockSpec((48, HID), lambda t: (0, 0)),                      # packed conv W
            pl.BlockSpec((8, FC_OUT), lambda t: (0, 0)),                    # packed vectors
            pl.BlockSpec((NODES_PER_GRAPH, GRAPHS_PER_TILE, TILE_NODES),
                         lambda t: (0, 0, 0)),                              # sel
            pl.BlockSpec((NODES_PER_GRAPH, HID, FC_OUT), lambda t: (0, 0, 0)),  # fc weight
        ],
        out_specs=pl.BlockSpec((step_graphs, FC_OUT), lambda t: (t, 0)),
    )

    kernel = functools.partial(chebnet_step_kernel, blocks=blocks_per_step)

    out_pad = pl.pallas_call(
        kernel,
        out_shape=jax.ShapeDtypeStruct((g_pad, FC_OUT), jnp.float32),
        grid_spec=grid_spec,
        compiler_params=pltpu.CompilerParams(
            dimension_semantics=("parallel",)),
    )(s_tiles, x_pad, wcat, vcat, sel, fcw)

    return out_pad[:num_graphs]


def chebnet_wan_reference(params, x, edge_index, edge_attr, num_graphs):
    """Pure-JAX f32 reference (dense S) for correctness checking."""
    x = x.astype(jnp.float32)
    n = x.shape[0]
    src, dst = edge_index[0], edge_index[1]
    w = edge_attr.astype(jnp.float32)
    deg = jnp.zeros((n,), jnp.float32).at[src].add(w)
    dinv = jnp.where(deg > 0, jax.lax.rsqrt(deg), 0.0)
    norm = -dinv[src] * w * dinv[dst]
    S = jnp.zeros((n, n), jnp.float32).at[dst, src].add(norm)

    inv_std = jax.lax.rsqrt(params["bn_var"] + BN_EPS)
    scale = params["bn_gamma"] * inv_std
    shift = params["bn_beta"] - params["bn_mean"] * scale

    def stage(h, w0, w1, b):
        z = h @ w0 + (S @ h) @ w1 + b
        return jnp.maximum(z, 0.0) * scale + shift

    h1 = stage(x, params["w1_0"], params["w1_1"], params["b1"])
    h2 = stage(h1, params["w2_0"], params["w2_1"], params["b2"]) + 0.7 * h1
    h3 = stage(h2, params["w3_0"], params["w3_1"], params["b3"]) + 0.7 * h2
    flat = h3.reshape(num_graphs, NODES_PER_GRAPH * HID)
    return flat @ params["fc_w"].T + params["fc_b"]


def init_params(key):
    ks = jax.random.split(key, 12)

    def w(k, shape, scale=0.2):
        return scale * jax.random.normal(k, shape, jnp.float32)

    return {
        # ChebConv lins[k] weights, stored pre-transposed as [in, out]
        "w1_0": w(ks[0], (IN_CH, HID)), "w1_1": w(ks[1], (IN_CH, HID)),
        "b1": w(ks[2], (1, HID)),
        "w2_0": w(ks[3], (HID, HID)), "w2_1": w(ks[4], (HID, HID)),
        "b2": w(ks[5], (1, HID)),
        "w3_0": w(ks[6], (HID, HID)), "w3_1": w(ks[7], (HID, HID)),
        "b3": w(ks[8], (1, HID)),
        # BatchNorm1d(6): affine params + running stats (eval mode)
        "bn_gamma": 1.0 + 0.1 * jax.random.normal(ks[9], (HID,), jnp.float32),
        "bn_beta": 0.05 * jax.random.normal(ks[10], (HID,), jnp.float32),
        "bn_mean": jnp.zeros((HID,), jnp.float32),
        "bn_var": jnp.ones((HID,), jnp.float32),
        # fc1 = Linear(42, 16), torch convention weight [out, in]
        "fc_w": w(ks[11], (FC_OUT, NODES_PER_GRAPH * HID)),
        "fc_b": jnp.zeros((FC_OUT,), jnp.float32),
    }


def _make_graphs(num_graphs, wkey):
    """Deterministic bidirectional ring inside each graph + random positive weights."""
    srcs, dsts = [], []
    for g in range(num_graphs):
        base = g * NODES_PER_GRAPH
        for i in range(NODES_PER_GRAPH):
            j = (i + 1) % NODES_PER_GRAPH
            srcs += [base + i, base + j]
            dsts += [base + j, base + i]
    edge_index = jnp.array([srcs, dsts], dtype=jnp.int32)
    edge_attr = 0.5 + jax.random.uniform(wkey, (edge_index.shape[1],), jnp.float32)
    return edge_index, edge_attr


if __name__ == "__main__":
    key = jax.random.PRNGKey(0)
    pkey, xkey1, wkey1, xkey2, wkey2 = jax.random.split(key, 5)
    params = init_params(pkey)

    ok = True
    for num_graphs, xkey, wkey in ((2, xkey1, wkey1), (20, xkey2, wkey2)):
        n = num_graphs * NODES_PER_GRAPH
        x = jax.random.normal(xkey, (n, IN_CH), jnp.float32)
        edge_index, edge_attr = _make_graphs(num_graphs, wkey)

        out = chebnet_wan_forward(params, x, edge_index, edge_attr, num_graphs)
        out = jax.block_until_ready(out)
        assert out.shape == (num_graphs, FC_OUT) and out.dtype == jnp.float32

        ref = chebnet_wan_reference(params, x, edge_index, edge_attr, num_graphs)
        max_diff = float(jnp.max(jnp.abs(out - ref)))
        # Only error source is the one-time bf16 rounding of S / x (f32 accumulation).
        ok = ok and (max_diff < 5e-2)

    if ok:
        print("KERNEL_OK")
</pallas_src>

<mosaic_0001>
module attributes {stable_mosaic.version = 11 : i64} {
  func.func @chebnet_step_kernel(%arg0: i32, %arg1: memref<56x56xbf16, #tpu.memory_space<vmem>>, %arg2: memref<56x7xbf16, #tpu.memory_space<vmem>>, %arg3: memref<48x6xf32, #tpu.memory_space<vmem>>, %arg4: memref<8x16xf32, #tpu.memory_space<vmem>>, %arg5: memref<7x8x56xf32, #tpu.memory_space<vmem>>, %arg6: memref<7x6x16xf32, #tpu.memory_space<vmem>>, %arg7: memref<8x16xf32, #tpu.memory_space<vmem>>) attributes {dimension_semantics = [#tpu.dimension_semantics<parallel>], iteration_bounds = array<i64: 1>, scalar_prefetch = 0 : i64, scratch_operands = 0 : i64, tpu.core_type = #tpu.core_type<tc>, window_params = [{transform_indices = @transform_0, window_bounds = array<i64: 56, 56>}, {transform_indices = @transform_1, window_bounds = array<i64: 56, 7>}, {pipeline_mode = #tpu.pipeline_mode<synchronous>, transform_indices = @transform_2, window_bounds = array<i64: 48, 6>}, {pipeline_mode = #tpu.pipeline_mode<synchronous>, transform_indices = @transform_3, window_bounds = array<i64: 8, 16>}, {pipeline_mode = #tpu.pipeline_mode<synchronous>, transform_indices = @transform_4, window_bounds = array<i64: 7, 8, 56>}, {pipeline_mode = #tpu.pipeline_mode<synchronous>, transform_indices = @transform_5, window_bounds = array<i64: 7, 6, 16>}, {transform_indices = @transform_6, window_bounds = array<i64: 8, 16>}]} {
    %c0 = arith.constant 0 : index
    %c0_0 = arith.constant 0 : index
    %0 = vector.load %arg3[%c0, %c0_0] : memref<48x6xf32, #tpu.memory_space<vmem>>, vector<48x6xf32>
    %1 = vector.extract_strided_slice %0 {offsets = [0, 0], sizes = [7, 6], strides = [1, 1]} : vector<48x6xf32> to vector<7x6xf32>
    %2 = vector.extract_strided_slice %0 {offsets = [8, 0], sizes = [7, 6], strides = [1, 1]} : vector<48x6xf32> to vector<7x6xf32>
    %3 = vector.extract_strided_slice %0 {offsets = [16, 0], sizes = [6, 6], strides = [1, 1]} : vector<48x6xf32> to vector<6x6xf32>
    %4 = vector.extract_strided_slice %0 {offsets = [24, 0], sizes = [6, 6], strides = [1, 1]} : vector<48x6xf32> to vector<6x6xf32>
    %5 = vector.extract_strided_slice %0 {offsets = [32, 0], sizes = [6, 6], strides = [1, 1]} : vector<48x6xf32> to vector<6x6xf32>
    %6 = vector.extract_strided_slice %0 {offsets = [40, 0], sizes = [6, 6], strides = [1, 1]} : vector<48x6xf32> to vector<6x6xf32>
    %c0_1 = arith.constant 0 : index
    %c0_2 = arith.constant 0 : index
    %7 = vector.load %arg4[%c0_1, %c0_2] : memref<8x16xf32, #tpu.memory_space<vmem>>, vector<8x16xf32>
    %8 = vector.extract_strided_slice %7 {offsets = [0, 0], sizes = [1, 6], strides = [1, 1]} : vector<8x16xf32> to vector<1x6xf32>
    %9 = vector.extract_strided_slice %7 {offsets = [1, 0], sizes = [1, 6], strides = [1, 1]} : vector<8x16xf32> to vector<1x6xf32>
    %10 = vector.extract_strided_slice %7 {offsets = [2, 0], sizes = [1, 6], strides = [1, 1]} : vector<8x16xf32> to vector<1x6xf32>
    %11 = vector.extract_strided_slice %7 {offsets = [3, 0], sizes = [1, 6], strides = [1, 1]} : vector<8x16xf32> to vector<1x6xf32>
    %12 = vector.extract_strided_slice %7 {offsets = [4, 0], sizes = [1, 6], strides = [1, 1]} : vector<8x16xf32> to vector<1x6xf32>
    %13 = vector.extract_strided_slice %7 {offsets = [5, 0], sizes = [1, 16], strides = [1, 1]} : vector<8x16xf32> to vector<1x16xf32>
    %c0_3 = arith.constant 0 : index
    %c0_4 = arith.constant 0 : index
    %14 = vector.load %arg1[%c0_3, %c0_4] : memref<56x56xbf16, #tpu.memory_space<vmem>>, vector<56x56xbf16>
    %15 = arith.extf %14 : vector<56x56xbf16> to vector<56x56xf32>
    %c0_5 = arith.constant 0 : index
    %c0_6 = arith.constant 0 : index
    %16 = vector.load %arg2[%c0_5, %c0_6] : memref<56x7xbf16, #tpu.memory_space<vmem>>, vector<56x7xbf16>
    %17 = arith.extf %16 : vector<56x7xbf16> to vector<56x7xf32>
    %cst = arith.constant dense<0.000000e+00> : vector<56x7xf32>
    %18 = tpu.matmul %15, %17, %cst {dimension_numbers = #tpu.dot_dimension_numbers<[1], [0], [0], [1], [0, 0, 1, 1], [], []>} : vector<56x56xf32>, vector<56x7xf32>, vector<56x7xf32> -> vector<56x7xf32>
    %cst_7 = arith.constant dense<0.000000e+00> : vector<56x6xf32>
    %19 = tpu.matmul %17, %1, %cst_7 {dimension_numbers = #tpu.dot_dimension_numbers<[1], [0], [0], [1], [0, 0, 1, 1], [], []>} : vector<56x7xf32>, vector<7x6xf32>, vector<56x6xf32> -> vector<56x6xf32>
    %cst_8 = arith.constant dense<0.000000e+00> : vector<56x6xf32>
    %20 = tpu.matmul %18, %2, %cst_8 {dimension_numbers = #tpu.dot_dimension_numbers<[1], [0], [0], [1], [0, 0, 1, 1], [], []>} : vector<56x7xf32>, vector<7x6xf32>, vector<56x6xf32> -> vector<56x6xf32>
    %21 = arith.addf %19, %20 : vector<56x6xf32>
    %22 = vector.broadcast %8 : vector<1x6xf32> to vector<56x6xf32>
    %23 = arith.addf %21, %22 : vector<56x6xf32>
    %cst_9 = arith.constant 0.000000e+00 : f32
    %24 = vector.broadcast %cst_9 : f32 to vector<56x6xf32>
    %25 = arith.maximumf %23, %24 : vector<56x6xf32>
    %26 = vector.broadcast %11 : vector<1x6xf32> to vector<56x6xf32>
    %27 = arith.mulf %25, %26 : vector<56x6xf32>
    %28 = vector.broadcast %12 : vector<1x6xf32> to vector<56x6xf32>
    %29 = arith.addf %27, %28 : vector<56x6xf32>
    %cst_10 = arith.constant dense<0.000000e+00> : vector<56x6xf32>
    %30 = tpu.matmul %15, %29, %cst_10 {dimension_numbers = #tpu.dot_dimension_numbers<[1], [0], [0], [1], [0, 0, 1, 1], [], []>} : vector<56x56xf32>, vector<56x6xf32>, vector<56x6xf32> -> vector<56x6xf32>
    %cst_11 = arith.constant dense<0.000000e+00> : vector<56x6xf32>
    %31 = tpu.matmul %29, %3, %cst_11 {dimension_numbers = #tpu.dot_dimension_numbers<[1], [0], [0], [1], [0, 0, 1, 1], [], []>} : vector<56x6xf32>, vector<6x6xf32>, vector<56x6xf32> -> vector<56x6xf32>
    %cst_12 = arith.constant dense<0.000000e+00> : vector<56x6xf32>
    %32 = tpu.matmul %30, %4, %cst_12 {dimension_numbers = #tpu.dot_dimension_numbers<[1], [0], [0], [1], [0, 0, 1, 1], [], []>} : vector<56x6xf32>, vector<6x6xf32>, vector<56x6xf32> -> vector<56x6xf32>
    %33 = arith.addf %31, %32 : vector<56x6xf32>
    %34 = vector.broadcast %9 : vector<1x6xf32> to vector<56x6xf32>
    %35 = arith.addf %33, %34 : vector<56x6xf32>
    %cst_13 = arith.constant 0.000000e+00 : f32
    %36 = vector.broadcast %cst_13 : f32 to vector<56x6xf32>
    %37 = arith.maximumf %35, %36 : vector<56x6xf32>
    %38 = vector.broadcast %11 : vector<1x6xf32> to vector<56x6xf32>
    %39 = arith.mulf %37, %38 : vector<56x6xf32>
    %40 = vector.broadcast %12 : vector<1x6xf32> to vector<56x6xf32>
    %41 = arith.addf %39, %40 : vector<56x6xf32>
    %cst_14 = arith.constant 0.699999988 : f32
    %42 = vector.broadcast %cst_14 : f32 to vector<56x6xf32>
    %43 = arith.mulf %42, %29 : vector<56x6xf32>
    %44 = arith.addf %41, %43 : vector<56x6xf32>
    %cst_15 = arith.constant dense<0.000000e+00> : vector<56x6xf32>
    %45 = tpu.matmul %15, %44, %cst_15 {dimension_numbers = #tpu.dot_dimension_numbers<[1], [0], [0], [1], [0, 0, 1, 1], [], []>} : vector<56x56xf32>, vector<56x6xf32>, vector<56x6xf32> -> vector<56x6xf32>
    %cst_16 = arith.constant dense<0.000000e+00> : vector<56x6xf32>
    %46 = tpu.matmul %44, %5, %cst_16 {dimension_numbers = #tpu.dot_dimension_numbers<[1], [0], [0], [1], [0, 0, 1, 1], [], []>} : vector<56x6xf32>, vector<6x6xf32>, vector<56x6xf32> -> vector<56x6xf32>
    %cst_17 = arith.constant dense<0.000000e+00> : vector<56x6xf32>
    %47 = tpu.matmul %45, %6, %cst_17 {dimension_numbers = #tpu.dot_dimension_numbers<[1], [0], [0], [1], [0, 0, 1, 1], [], []>} : vector<56x6xf32>, vector<6x6xf32>, vector<56x6xf32> -> vector<56x6xf32>
    %48 = arith.addf %46, %47 : vector<56x6xf32>
    %49 = vector.broadcast %10 : vector<1x6xf32> to vector<56x6xf32>
    %50 = arith.addf %48, %49 : vector<56x6xf32>
    %cst_18 = arith.constant 0.000000e+00 : f32
    %51 = vector.broadcast %cst_18 : f32 to vector<56x6xf32>
    %52 = arith.maximumf %50, %51 : vector<56x6xf32>
    %53 = vector.broadcast %11 : vector<1x6xf32> to vector<56x6xf32>
    %54 = arith.mulf %52, %53 : vector<56x6xf32>
    %55 = vector.broadcast %12 : vector<1x6xf32> to vector<56x6xf32>
    %56 = arith.addf %54, %55 : vector<56x6xf32>
    %cst_19 = arith.constant 0.699999988 : f32
    %57 = vector.broadcast %cst_19 : f32 to vector<56x6xf32>
    %58 = arith.mulf %57, %44 : vector<56x6xf32>
    %59 = arith.addf %56, %58 : vector<56x6xf32>
    %cst_20 = arith.constant 0.000000e+00 : f32
    %60 = vector.broadcast %cst_20 : f32 to vector<8x16xf32>
    %c0_21 = arith.constant 0 : index
    %c0_22 = arith.constant 0 : index
    %c0_23 = arith.constant 0 : index
    %61 = vector.load %arg5[%c0_21, %c0_22, %c0_23] : memref<7x8x56xf32, #tpu.memory_space<vmem>>, vector<1x8x56xf32>
    %62 = vector.shape_cast %61 : vector<1x8x56xf32> to vector<8x56xf32>
    %cst_24 = arith.constant dense<0.000000e+00> : vector<8x6xf32>
    %63 = tpu.matmul %62, %59, %cst_24 {dimension_numbers = #tpu.dot_dimension_numbers<[1], [0], [0], [1], [0, 0, 1, 1], [], []>} : vector<8x56xf32>, vector<56x6xf32>, vector<8x6xf32> -> vector<8x6xf32>
    %c0_25 = arith.constant 0 : index
    %c0_26 = arith.constant 0 : index
    %c0_27 = arith.constant 0 : index
    %64 = vector.load %arg6[%c0_25, %c0_26, %c0_27] : memref<7x6x16xf32, #tpu.memory_space<vmem>>, vector<1x6x16xf32>
    %65 = vector.shape_cast %64 : vector<1x6x16xf32> to vector<6x16xf32>
    %cst_28 = arith.constant dense<0.000000e+00> : vector<8x16xf32>
    %66 = tpu.matmul %63, %65, %cst_28 {dimension_numbers = #tpu.dot_dimension_numbers<[1], [0], [0], [1], [0, 0, 1, 1], [], []>} : vector<8x6xf32>, vector<6x16xf32>, vector<8x16xf32> -> vector<8x16xf32>
    %67 = arith.addf %60, %66 : vector<8x16xf32>
    %c1 = arith.constant 1 : index
    %c0_29 = arith.constant 0 : index
    %c0_30 = arith.constant 0 : index
    %68 = vector.load %arg5[%c1, %c0_29, %c0_30] : memref<7x8x56xf32, #tpu.memory_space<vmem>>, vector<1x8x56xf32>
    %69 = vector.shape_cast %68 : vector<1x8x56xf32> to vector<8x56xf32>
    %cst_31 = arith.constant dense<0.000000e+00> : vector<8x6xf32>
    %70 = tpu.matmul %69, %59, %cst_31 {dimension_numbers = #tpu.dot_dimension_numbers<[1], [0], [0], [1], [0, 0, 1, 1], [], []>} : vector<8x56xf32>, vector<56x6xf32>, vector<8x6xf32> -> vector<8x6xf32>
    %c1_32 = arith.constant 1 : index
    %c0_33 = arith.constant 0 : index
    %c0_34 = arith.constant 0 : index
    %71 = vector.load %arg6[%c1_32, %c0_33, %c0_34] : memref<7x6x16xf32, #tpu.memory_space<vmem>>, vector<1x6x16xf32>
    %72 = vector.shape_cast %71 : vector<1x6x16xf32> to vector<6x16xf32>
    %cst_35 = arith.constant dense<0.000000e+00> : vector<8x16xf32>
    %73 = tpu.matmul %70, %72, %cst_35 {dimension_numbers = #tpu.dot_dimension_numbers<[1], [0], [0], [1], [0, 0, 1, 1], [], []>} : vector<8x6xf32>, vector<6x16xf32>, vector<8x16xf32> -> vector<8x16xf32>
    %74 = arith.addf %67, %73 : vector<8x16xf32>
    %c2 = arith.constant 2 : index
    %c0_36 = arith.constant 0 : index
    %c0_37 = arith.constant 0 : index
    %75 = vector.load %arg5[%c2, %c0_36, %c0_37] : memref<7x8x56xf32, #tpu.memory_space<vmem>>, vector<1x8x56xf32>
    %76 = vector.shape_cast %75 : vector<1x8x56xf32> to vector<8x56xf32>
    %cst_38 = arith.constant dense<0.000000e+00> : vector<8x6xf32>
    %77 = tpu.matmul %76, %59, %cst_38 {dimension_numbers = #tpu.dot_dimension_numbers<[1], [0], [0], [1], [0, 0, 1, 1], [], []>} : vector<8x56xf32>, vector<56x6xf32>, vector<8x6xf32> -> vector<8x6xf32>
    %c2_39 = arith.constant 2 : index
    %c0_40 = arith.constant 0 : index
    %c0_41 = arith.constant 0 : index
    %78 = vector.load %arg6[%c2_39, %c0_40, %c0_41] : memref<7x6x16xf32, #tpu.memory_space<vmem>>, vector<1x6x16xf32>
    %79 = vector.shape_cast %78 : vector<1x6x16xf32> to vector<6x16xf32>
    %cst_42 = arith.constant dense<0.000000e+00> : vector<8x16xf32>
    %80 = tpu.matmul %77, %79, %cst_42 {dimension_numbers = #tpu.dot_dimension_numbers<[1], [0], [0], [1], [0, 0, 1, 1], [], []>} : vector<8x6xf32>, vector<6x16xf32>, vector<8x16xf32> -> vector<8x16xf32>
    %81 = arith.addf %74, %80 : vector<8x16xf32>
    %c3 = arith.constant 3 : index
    %c0_43 = arith.constant 0 : index
    %c0_44 = arith.constant 0 : index
    %82 = vector.load %arg5[%c3, %c0_43, %c0_44] : memref<7x8x56xf32, #tpu.memory_space<vmem>>, vector<1x8x56xf32>
    %83 = vector.shape_cast %82 : vector<1x8x56xf32> to vector<8x56xf32>
    %cst_45 = arith.constant dense<0.000000e+00> : vector<8x6xf32>
    %84 = tpu.matmul %83, %59, %cst_45 {dimension_numbers = #tpu.dot_dimension_numbers<[1], [0], [0], [1], [0, 0, 1, 1], [], []>} : vector<8x56xf32>, vector<56x6xf32>, vector<8x6xf32> -> vector<8x6xf32>
    %c3_46 = arith.constant 3 : index
    %c0_47 = arith.constant 0 : index
    %c0_48 = arith.constant 0 : index
    %85 = vector.load %arg6[%c3_46, %c0_47, %c0_48] : memref<7x6x16xf32, #tpu.memory_space<vmem>>, vector<1x6x16xf32>
    %86 = vector.shape_cast %85 : vector<1x6x16xf32> to vector<6x16xf32>
    %cst_49 = arith.constant dense<0.000000e+00> : vector<8x16xf32>
    %87 = tpu.matmul %84, %86, %cst_49 {dimension_numbers = #tpu.dot_dimension_numbers<[1], [0], [0], [1], [0, 0, 1, 1], [], []>} : vector<8x6xf32>, vector<6x16xf32>, vector<8x16xf32> -> vector<8x16xf32>
    %88 = arith.addf %81, %87 : vector<8x16xf32>
    %c4 = arith.constant 4 : index
    %c0_50 = arith.constant 0 : index
    %c0_51 = arith.constant 0 : index
    %89 = vector.load %arg5[%c4, %c0_50, %c0_51] : memref<7x8x56xf32, #tpu.memory_space<vmem>>, vector<1x8x56xf32>
    %90 = vector.shape_cast %89 : vector<1x8x56xf32> to vector<8x56xf32>
    %cst_52 = arith.constant dense<0.000000e+00> : vector<8x6xf32>
    %91 = tpu.matmul %90, %59, %cst_52 {dimension_numbers = #tpu.dot_dimension_numbers<[1], [0], [0], [1], [0, 0, 1, 1], [], []>} : vector<8x56xf32>, vector<56x6xf32>, vector<8x6xf32> -> vector<8x6xf32>
    %c4_53 = arith.constant 4 : index
    %c0_54 = arith.constant 0 : index
    %c0_55 = arith.constant 0 : index
    %92 = vector.load %arg6[%c4_53, %c0_54, %c0_55] : memref<7x6x16xf32, #tpu.memory_space<vmem>>, vector<1x6x16xf32>
    %93 = vector.shape_cast %92 : vector<1x6x16xf32> to vector<6x16xf32>
    %cst_56 = arith.constant dense<0.000000e+00> : vector<8x16xf32>
    %94 = tpu.matmul %91, %93, %cst_56 {dimension_numbers = #tpu.dot_dimension_numbers<[1], [0], [0], [1], [0, 0, 1, 1], [], []>} : vector<8x6xf32>, vector<6x16xf32>, vector<8x16xf32> -> vector<8x16xf32>
    %95 = arith.addf %88, %94 : vector<8x16xf32>
    %c5 = arith.constant 5 : index
    %c0_57 = arith.constant 0 : index
    %c0_58 = arith.constant 0 : index
    %96 = vector.load %arg5[%c5, %c0_57, %c0_58] : memref<7x8x56xf32, #tpu.memory_space<vmem>>, vector<1x8x56xf32>
    %97 = vector.shape_cast %96 : vector<1x8x56xf32> to vector<8x56xf32>
    %cst_59 = arith.constant dense<0.000000e+00> : vector<8x6xf32>
    %98 = tpu.matmul %97, %59, %cst_59 {dimension_numbers = #tpu.dot_dimension_numbers<[1], [0], [0], [1], [0, 0, 1, 1], [], []>} : vector<8x56xf32>, vector<56x6xf32>, vector<8x6xf32> -> vector<8x6xf32>
    %c5_60 = arith.constant 5 : index
    %c0_61 = arith.constant 0 : index
    %c0_62 = arith.constant 0 : index
    %99 = vector.load %arg6[%c5_60, %c0_61, %c0_62] : memref<7x6x16xf32, #tpu.memory_space<vmem>>, vector<1x6x16xf32>
    %100 = vector.shape_cast %99 : vector<1x6x16xf32> to vector<6x16xf32>
    %cst_63 = arith.constant dense<0.000000e+00> : vector<8x16xf32>
    %101 = tpu.matmul %98, %100, %cst_63 {dimension_numbers = #tpu.dot_dimension_numbers<[1], [0], [0], [1], [0, 0, 1, 1], [], []>} : vector<8x6xf32>, vector<6x16xf32>, vector<8x16xf32> -> vector<8x16xf32>
    %102 = arith.addf %95, %101 : vector<8x16xf32>
    %c6 = arith.constant 6 : index
    %c0_64 = arith.constant 0 : index
    %c0_65 = arith.constant 0 : index
    %103 = vector.load %arg5[%c6, %c0_64, %c0_65] : memref<7x8x56xf32, #tpu.memory_space<vmem>>, vector<1x8x56xf32>
    %104 = vector.shape_cast %103 : vector<1x8x56xf32> to vector<8x56xf32>
    %cst_66 = arith.constant dense<0.000000e+00> : vector<8x6xf32>
    %105 = tpu.matmul %104, %59, %cst_66 {dimension_numbers = #tpu.dot_dimension_numbers<[1], [0], [0], [1], [0, 0, 1, 1], [], []>} : vector<8x56xf32>, vector<56x6xf32>, vector<8x6xf32> -> vector<8x6xf32>
    %c6_67 = arith.constant 6 : index
    %c0_68 = arith.constant 0 : index
    %c0_69 = arith.constant 0 : index
    %106 = vector.load %arg6[%c6_67, %c0_68, %c0_69] : memref<7x6x16xf32, #tpu.memory_space<vmem>>, vector<1x6x16xf32>
    %107 = vector.shape_cast %106 : vector<1x6x16xf32> to vector<6x16xf32>
    %cst_70 = arith.constant dense<0.000000e+00> : vector<8x16xf32>
    %108 = tpu.matmul %105, %107, %cst_70 {dimension_numbers = #tpu.dot_dimension_numbers<[1], [0], [0], [1], [0, 0, 1, 1], [], []>} : vector<8x6xf32>, vector<6x16xf32>, vector<8x16xf32> -> vector<8x16xf32>
    %109 = arith.addf %102, %108 : vector<8x16xf32>
    %110 = vector.broadcast %13 : vector<1x16xf32> to vector<8x16xf32>
    %111 = arith.addf %109, %110 : vector<8x16xf32>
    %c0_71 = arith.constant 0 : index
    %c0_72 = arith.constant 0 : index
    %112 = vector.load %arg7[%c0_71, %c0_72] : memref<8x16xf32, #tpu.memory_space<vmem>>, vector<8x16xf32>
    tpu.vector_store %arg7[%c0_71, %c0_72], %111 {strides = array<i32>} : memref<8x16xf32, #tpu.memory_space<vmem>>, vector<8x16xf32>,
    return
  }
  func.func @transform_0(%arg0: i32) -> (i32, i32) {
    %c0_i32 = arith.constant 0 : i32
    %c0_i32_0 = arith.constant 0 : i32
    return %arg0, %c0_i32 : i32, i32
  }
  func.func @transform_1(%arg0: i32) -> (i32, i32) {
    %c0_i32 = arith.constant 0 : i32
    %c0_i32_0 = arith.constant 0 : i32
    return %arg0, %c0_i32 : i32, i32
  }
  func.func @transform_2(%arg0: i32) -> (i32, i32) {
    %c0_i32 = arith.constant 0 : i32
    %c0_i32_0 = arith.constant 0 : i32
    %c0_i32_1 = arith.constant 0 : i32
    return %c0_i32, %c0_i32_0 : i32, i32
  }
  func.func @transform_3(%arg0: i32) -> (i32, i32) {
    %c0_i32 = arith.constant 0 : i32
    %c0_i32_0 = arith.constant 0 : i32
    %c0_i32_1 = arith.constant 0 : i32
    return %c0_i32, %c0_i32_0 : i32, i32
  }
  func.func @transform_4(%arg0: i32) -> (i32, i32, i32) {
    %c0_i32 = arith.constant 0 : i32
    %c0_i32_0 = arith.constant 0 : i32
    %c0_i32_1 = arith.constant 0 : i32
    %c0_i32_2 = arith.constant 0 : i32
    return %c0_i32, %c0_i32_0, %c0_i32_1 : i32, i32, i32
  }
  func.func @transform_5(%arg0: i32) -> (i32, i32, i32) {
    %c0_i32 = arith.constant 0 : i32
    %c0_i32_0 = arith.constant 0 : i32
    %c0_i32_1 = arith.constant 0 : i32
    %c0_i32_2 = arith.constant 0 : i32
    return %c0_i32, %c0_i32_0, %c0_i32_1 : i32, i32, i32
  }
  func.func @transform_6(%arg0: i32) -> (i32, i32) {
    %c0_i32 = arith.constant 0 : i32
    %c0_i32_0 = arith.constant 0 : i32
    return %arg0, %c0_i32 : i32, i32
  }
}

</mosaic_0001>

<bundles_post_ra>
// kernel: chebnet_wan_forward.1
= control target key start
LH: loop header
LB: loop body
LE: loop exit
PB: predicated region body
PF: predicated region fallthrough
CT: control target
= control target key end

     0   :  { %v3037_v0 = vmov 0.0   ;;  %vm3038_vm0 = vmmov 0   ;;  %vm58_vm1 = vcmask 457728   ;;  %vm202_vm2 = vcmask 1046528   ;;  %s3770_s1 = inlined_call_operand.vmem [shape: bf16[56,7], index: 1, kind: input, shape index: {}]   ;;  %s3771_s0 = inlined_call_operand.vmem [shape: bf16[56,56], index: 0, kind: input, shape index: {}]   ;;  %s3772_s2 = inlined_call_operand.vmem [shape: f32[48,6], index: 2, kind: input, shape index: {}]   ;;  %s3773_s3 = inlined_call_operand.vmem [shape: f32[8,16], index: 3, kind: input, shape index: {}]   ;;  %s3774_s5 = inlined_call_operand.vmem [shape: f32[7,6,16], index: 5, kind: input, shape index: {}]   ;;  %s3775_s4 = inlined_call_operand.vmem [shape: f32[7,8,56], index: 4, kind: input, shape index: {}]   ;;  %s3776_s6 = inlined_call_operand.vmem [shape: f32[8,16], index: 6, kind: output, shape index: {}]  }
   0x1   :  { %2635 = vmatprep.subr.mxu0 %v3037_v0  ;;  %v3078_v1 = vld [vmem:[%s3770_s1 + $0x18] sm:$0xf]  ;;  %v3083_v2 = vld [vmem:[%s3770_s1 + $0x10] sm:$0xff]   ;;  %2649 = vmatprep.mubr.msk.f32.mxu0 %vm3038_vm0, %v3037_v0  ;;  %v3095_v5 = vld [vmem:[%s3770_s1 + $0x8] sm:$0xff]   ;;  %vm180_vm3 = vcmask 56320   ;;  %vm592_vm4 = vcmask 1045504   ;;  %v430_v59 = vlaneseq }
   0x2   :  { %v57_v3 = vunpack.c.l.bf16 %v3078_v1  ;;  %v2470_v4 = vunpack.c.h.bf16 %v3083_v2  ;;  %2670 = vmatprep.subr.mxu1 %v3037_v0  ;;  %2672 = vmatprep.mubr.msk.f32.mxu1 %vm3038_vm0, %v3037_v0  ;;  %v2469_v6 = vunpack.c.l.bf16 %v3083_v2  ;;  %v2466_v7 = vunpack.c.h.bf16 %v3095_v5  ;;  %v3108_v8 = vld [vmem:[%s3770_s1] sm:$0xff]   ;;  %v2471_v15 = vld [vmem:[%s3771_s0 + $0x8] sm:$0xff]   ;;  %v2472_v18 = vld [vmem:[%s3771_s0 + $0x10] sm:$0xff]  }
   0x3   :  { %v2465_v9 = vunpack.c.l.bf16 %v3095_v5  ;;  %v2462_v10 = vunpack.c.h.bf16 %v3108_v8  ;;  %v2448_v11 = vld [vmem:[%s3771_s0] sm:$0xff]   ;;  %v2461_v12 = vunpack.c.l.bf16 %v3108_v8  ;;  %v3144_v16 = vunpack.c.l.bf16 %v2471_v15  ;;  %v36_v21 = vld [vmem:[%s3771_s0 + $0x18] sm:$0xf]  ;;  %v24_v23 = vld [vmem:[%s3772_s2 + $0x8] sm:$0xff] }
   0x4   :  { %2636 = vmatpush3.msra.mxu0 %v57_v3  ;;  %v3125_v13 = vunpack.c.l.bf16 %v2448_v11  ;;  %v3134_v14 = vunpack.c.h.bf16 %v2448_v11  ;;  %v3150_v17 = vunpack.c.h.bf16 %v2471_v15  ;;  %v3159_v19 = vunpack.c.l.bf16 %v2472_v18  ;;  %2671 = vmatpush3.msk.msra.mxu1 %vm202_vm2, %v24_v23  ;;  %v23_v24 = vld [vmem:[%s3772_s2] sm:$0xff]  ;;  %v3249_v39 = vld [vmem:[%s3772_s2 + $0x18] sm:$0xff] }
   0x5   :  { %2637 = vmatprep.subr.mxu0 %v3037_v0  ;;  %v3165_v20 = vunpack.c.h.bf16 %v2472_v18  ;;  %v3174_v22 = vunpack.c.l.bf16 %v36_v21  ;;  %2693 = vmatprep.subr.mxu1 %v3037_v0  ;;  %v3254_v62 = vshrl.u32 %v430_v59, 7  ;;  %vm570_vm5 = vcmask 48128  }
   0x6   :  { %2638 = vmatpush3.msra.mxu0 %v2470_v4  ;;  %vm2339_vm6 = vcmask 130048  }
   0x7   :  { %2639 = vmatprep.subr.mxu0 %v3037_v0  ;;  %v432_v2 = vsub.s32 0, %v3254_v62 }
   0x8   :  { %2640 = vmatpush3.msra.mxu0 %v2469_v6 }
   0x9   :  { %2641 = vmatprep.subr.mxu0 %v3037_v0 }
   0xa   :  { %2642 = vmatpush3.msra.mxu0 %v2466_v7 }
   0xb   :  { %2643 = vmatprep.subr.mxu0 %v3037_v0 }
   0xc   :  { %2644 = vmatpush3.msra.mxu0 %v2465_v9 }
   0xd   :  { %2645 = vmatprep.subr.mxu0 %v3037_v0 }
   0xe   :  { %2646 = vmatpush3.msra.mxu0 %v2462_v10 }
   0xf   :  { %2647 = vmatprep.subr.mxu0 %v3037_v0 }
  0x10   :  { %2648 = vmatpush3.msra.mxu0 %v2461_v12 }
  0x11   :  { %2650 = vmatmul.mubr.msk.f32.vlgmr.msra.gmra.mxu0 %vm58_vm1, %v3125_v13  ;;  %2716 = vmatprep.subr.mxu0 %v3037_v0 }
  0x12   :  { %2652 = vmatprep.mubr.msk.f32.mxu0 %vm3038_vm0, %v3037_v0 }
  0x15   :  { %2653 = vmatmul.mubr.msk.f32.gmra.mxu0 %vm58_vm1, %v3134_v14 }
  0x16   :  { %2655 = vmatprep.mubr.msk.f32.mxu0 %vm3038_vm0, %v3037_v0 }
  0x19   :  { %2656 = vmatmul.mubr.msk.f32.gmra.mxu0 %vm58_vm1, %v3144_v16 }
  0x1a   :  { %2658 = vmatprep.mubr.msk.f32.mxu0 %vm3038_vm0, %v3037_v0 }
  0x1d   :  { %2659 = vmatmul.mubr.msk.f32.gmra.mxu0 %vm58_vm1, %v3150_v17 }
  0x1e   :  { %2661 = vmatprep.mubr.msk.f32.mxu0 %vm3038_vm0, %v3037_v0 }
  0x21   :  { %2662 = vmatmul.mubr.msk.f32.gmra.mxu0 %vm58_vm1, %v3159_v19 }
  0x22   :  { %2664 = vmatprep.mubr.msk.f32.mxu0 %vm3038_vm0, %v3037_v0 }
  0x25   :  { %2665 = vmatmul.mubr.msk.f32.gmra.mxu0 %vm58_vm1, %v3165_v20 }
  0x26   :  { %2667 = vmatprep.mubr.msk.f32.mxu0 %vm3038_vm0, %v3037_v0 }
  0x29   :  { %2668 = vmatmul.mubr.msk.f32.gmra.mxu0 %vm58_vm1, %v3174_v22 }
  0x2a   :  { %2730 = vmatprep.mubr.msk.f32.mxu0 %vm3038_vm0, %v3037_v0 }
  0xd1   :  { %v146_v25 = vpop.f32.mrf.mxu0 }
  0xd2   :  { %2673 = vmatmul.mubr.msk.f32.vlgmr.msra.gmra.mxu1 %vm180_vm3, %v146_v25 }
  0xd3   :  { %v2651_v26 = vpop.f32.mrf.mxu0  ;;  %2675 = vmatprep.mubr.msk.f32.mxu1 %vm3038_vm0, %v3037_v0  ;;  %2694 = vmatpush3.msk.msra.mxu1 %vm202_vm2, %v23_v24  ;;  %v461_v24 = vsub.s32 4, %v3254_v62 }
  0xd4   :  { %3032 = vmatprep.subr.mxu1 %v3037_v0 }
  0xd5   :  { %v151_v27 = vpop.f32.mrf.mxu0 }
  0xd6   :  { %2676 = vmatmul.mubr.msk.f32.gmra.mxu1 %vm180_vm3, %v151_v27 }
  0xd7   :  { %v2654_v28 = vpop.f32.mrf.mxu0  ;;  %2678 = vmatprep.mubr.msk.f32.mxu1 %vm3038_vm0, %v3037_v0 }
  0xd9   :  { %v156_v29 = vpop.f32.mrf.mxu0 }
  0xda   :  { %2679 = vmatmul.mubr.msk.f32.gmra.mxu1 %vm180_vm3, %v156_v29 }
  0xdb   :  { %v2657_v30 = vpop.f32.mrf.mxu0  ;;  %2681 = vmatprep.mubr.msk.f32.mxu1 %vm3038_vm0, %v3037_v0 }
  0xdd   :  { %v161_v31 = vpop.f32.mrf.mxu0 }
  0xde   :  { %2682 = vmatmul.mubr.msk.f32.gmra.mxu1 %vm180_vm3, %v161_v31 }
  0xdf   :  { %v2660_v32 = vpop.f32.mrf.mxu0  ;;  %2684 = vmatprep.mubr.msk.f32.mxu1 %vm3038_vm0, %v3037_v0 }
  0xe1   :  { %v166_v33 = vpop.f32.mrf.mxu0 }
  0xe2   :  { %2685 = vmatmul.mubr.msk.f32.gmra.mxu1 %vm180_vm3, %v166_v33 }
  0xe3   :  { %v2663_v34 = vpop.f32.mrf.mxu0  ;;  %2687 = vmatprep.mubr.msk.f32.mxu1 %vm3038_vm0, %v3037_v0 }
  0xe5   :  { %v171_v35 = vpop.f32.mrf.mxu0 }
  0xe6   :  { %2688 = vmatmul.mubr.msk.f32.gmra.mxu1 %vm180_vm3, %v171_v35 }
  0xe7   :  { %v2666_v36 = vpop.f32.mrf.mxu0  ;;  %2690 = vmatprep.mubr.msk.f32.mxu1 %vm3038_vm0, %v3037_v0 }
  0xe9   :  { %v176_v37 = vpop.f32.mrf.mxu0 }
  0xea   :  { %2691 = vmatmul.mubr.msk.f32.gmra.mxu1 %vm180_vm3, %v176_v37 }
  0xeb   :  { %v2669_v38 = vpop.f32.mrf.mxu0  ;;  %2695 = vmatprep.mubr.msk.f32.mxu1 %vm3038_vm0, %v3037_v0 }
  0xee   :  { %2696 = vmatmul.mubr.msk.f32.vlgmr.msra.gmra.mxu1 %vm180_vm3, %v2461_v12  ;;  %v450_v12 = vsub.s32 3, %v3254_v62 }
  0xef   :  { %2698 = vmatprep.mubr.msk.f32.mxu1 %vm3038_vm0, %v3037_v0  ;;  %3033 = vmatpush3.msk.msra.mxu1 %vm592_vm4, %v3249_v39 }
  0xf0   :  { %2797 = vmatprep.subr.mxu1 %v3037_v0 }
  0xf2   :  { %2699 = vmatmul.mubr.msk.f32.gmra.mxu1 %vm180_vm3, %v2462_v10 }
  0xf3   :  { %2701 = vmatprep.mubr.msk.f32.mxu1 %vm3038_vm0, %v3037_v0 }
  0xf6   :  { %2702 = vmatmul.mubr.msk.f32.gmra.mxu1 %vm180_vm3, %v2465_v9 }
  0xf7   :  { %2704 = vmatprep.mubr.msk.f32.mxu1 %vm3038_vm0, %v3037_v0 }
  0xfa   :  { %2705 = vmatmul.mubr.msk.f32.gmra.mxu1 %vm180_vm3, %v2466_v7 }
  0xfb   :  { %2707 = vmatprep.mubr.msk.f32.mxu1 %vm3038_vm0, %v3037_v0 }
  0xfe   :  { %2708 = vmatmul.mubr.msk.f32.gmra.mxu1 %vm180_vm3, %v2469_v6 }
  0xff   :  { %2710 = vmatprep.mubr.msk.f32.mxu1 %vm3038_vm0, %v3037_v0 }
 0x102   :  { %2711 = vmatmul.mubr.msk.f32.gmra.mxu1 %vm180_vm3, %v2470_v4 }
 0x103   :  { %2713 = vmatprep.mubr.msk.f32.mxu1 %vm3038_vm0, %v3037_v0 }
 0x106   :  { %2714 = vmatmul.mubr.msk.f32.gmra.mxu1 %vm180_vm3, %v57_v3  ;;  %v3260_v3 = vld [vmem:[%s3773_s3] sm:$0xff] }
 0x107   :  { %2756 = vmatprep.mubr.msk.f32.mxu1 %vm3038_vm0, %v3037_v0  ;;  %v433_v6 = vrot.slane %v3260_v3, %v432_v2  ;;  %v3266_v30 = vrot.slane %v3260_v3, %v450_v12  ;;  %v3269_v35 = vrot.slane %v3260_v3, %v461_v24 }
 0x192   :  { %v272_v40 = vpop.f32.mrf.mxu1 }
 0x194   :  { %v2674_v41 = vpop.f32.mrf.mxu1 }
 0x196   :  { %v277_v42 = vpop.f32.mrf.mxu1 }
 0x198   :  { %v2677_v43 = vpop.f32.mrf.mxu1 }
 0x19a   :  { %v282_v44 = vpop.f32.mrf.mxu1 }
 0x19c   :  { %v2680_v45 = vpop.f32.mrf.mxu1 }
 0x19e   :  { %v287_v46 = vpop.f32.mrf.mxu1 }
 0x1a0   :  { %v2683_v47 = vpop.f32.mrf.mxu1 }
 0x1a2   :  { %v292_v48 = vpop.f32.mrf.mxu1 }
 0x1a4   :  { %v2686_v49 = vpop.f32.mrf.mxu1 }
 0x1a6   :  { %v297_v50 = vpop.f32.mrf.mxu1 }
 0x1a8   :  { %v2689_v51 = vpop.f32.mrf.mxu1 }
 0x1aa   :  { %v302_v52 = vpop.f32.mrf.mxu1 }
 0x1ac   :  { %v2692_v53 = vpop.f32.mrf.mxu1 }
 0x1ae   :  { %v396_v54 = vpop.f32.mrf.mxu1 }
 0x1af   :  { %v397_v31 = vadd.f32 %v396_v54, %v272_v40 }
 0x1b0   :  { %v2697_v55 = vpop.f32.mrf.mxu1 }
 0x1b2   :  { %v401_v56 = vpop.f32.mrf.mxu1 }
 0x1b3   :  { %v402_v26 = vadd.f32 %v401_v56, %v277_v42  ;;  %v434_v42 = vadd.f32 %v433_v6, %v397_v31 }
 0x1b4   :  { %v2700_v57 = vpop.f32.mrf.mxu1 }
 0x1b5   :  { %v435_v36 = vadd.f32 %v433_v6, %v402_v26 }
 0x1b6   :  { %v406_v58 = vpop.f32.mrf.mxu1 }
 0x1b7   :  { %v407_v18 = vadd.f32 %v406_v58, %v282_v44  ;;  %v442_v40 = vmax.f32 %v435_v36, 0.0 }
 0x1b8   :  { %v2703_v60 = vpop.f32.mrf.mxu1 }
 0x1b9   :  { %v436_v32 = vadd.f32 %v433_v6, %v407_v18  ;;  %v453_v51 = vmul.f32 %v3266_v30, %v442_v40 }
 0x1ba   :  { %v411_v61 = vpop.f32.mrf.mxu1 }
 0x1bb   :  { %v412_v10 = vadd.f32 %v411_v61, %v287_v46  ;;  %v443_v43 = vmax.f32 %v436_v32, 0.0  ;;  %v3302_v55 = vadd.f32 %v3269_v35, %v453_v51 }
 0x1bc   :  { %v2706_v63 = vpop.f32.mrf.mxu1 }
 0x1bd   :  { %v437_v27 = vadd.f32 %v433_v6, %v412_v10  ;;  %v454_v49 = vmul.f32 %v3266_v30, %v443_v43  ;;  %v28_v10 = vld [vmem:[%s3772_s2 + $0x28] sm:$0xff] }
 0x1be   :  { %v416_v1 = vpop.f32.mrf.mxu1 }
 0x1bf   :  { %v417_v7 = vadd.f32 %v416_v1, %v292_v48  ;;  %v444_v37 = vmax.f32 %v437_v27, 0.0  ;;  %v441_v48 = vmax.f32 %v434_v42, 0.0  ;;  %v3297_v54 = vadd.f32 %v3269_v35, %v454_v49 }
 0x1c0   :  { %v2709_v4 = vpop.f32.mrf.mxu1  ;;  %v822_v42 = vsub.s32 1, %v3254_v62 }
 0x1c1   :  { %v438_v21 = vadd.f32 %v433_v6, %v417_v7  ;;  %v455_v46 = vmul.f32 %v3266_v30, %v444_v37  ;;  %v452_v53 = vmul.f32 %v3266_v30, %v441_v48 }
 0x1c2   :  { %v421_v5 = vpop.f32.mrf.mxu1  ;;  %v823_v49 = vrot.slane %v3260_v3, %v822_v42 }
 0x1c3   :  { %v422_v8 = vadd.f32 %v421_v5, %v297_v50  ;;  %v445_v33 = vmax.f32 %v438_v21, 0.0  ;;  %v3307_v56 = vadd.f32 %v3269_v35, %v452_v53 }
 0x1c4   :  { %v2712_v9 = vpop.f32.mrf.mxu1 }
 0x1c5   :  { %v439_v11 = vadd.f32 %v433_v6, %v422_v8  ;;  %v456_v44 = vmul.f32 %v3266_v30, %v445_v33 }
 0x1c6   :  { %v426_v15 = vpop.f32.mrf.mxu1 }
 0x1c7   :  { %v427_v23 = vadd.f32 %v426_v15, %v302_v52  ;;  %v446_v28 = vmax.f32 %v439_v11, 0.0  ;;  %v3285_v50 = vadd.f32 %v3269_v35, %v456_v44  ;;  %v3291_v52 = vadd.f32 %v3269_v35, %v455_v46 }
 0x1c8   :  { %v2715_v25 = vpop.f32.mrf.mxu1 }
 0x1c9   :  { %v440_v29 = vadd.f32 %v433_v6, %v427_v23  ;;  %v457_v38 = vmul.f32 %v3266_v30, %v446_v28 }
 0x1cb   :  { %v447_v34 = vmax.f32 %v440_v29, 0.0  ;;  %v3279_v47 = vadd.f32 %v3269_v35, %v457_v38 }
 0x1cd   :  { %v458_v41 = vmul.f32 %v3266_v30, %v447_v34 }
 0x1cf   :  { %v3275_v45 = vadd.f32 %v3269_v35, %v458_v41 }
 0x1d1   :  { %2717 = vmatpush3.msra.mxu0 %v3275_v45 }
 0x1d2   :  { %2718 = vmatprep.subr.mxu0 %v3037_v0 }
 0x1d3   :  { %2719 = vmatpush3.msra.mxu0 %v3279_v47 }
 0x1d4   :  { %2720 = vmatprep.subr.mxu0 %v3037_v0 }
 0x1d5   :  { %2721 = vmatpush3.msra.mxu0 %v3285_v50 }
 0x1d6   :  { %2722 = vmatprep.subr.mxu0 %v3037_v0 }
 0x1d7   :  { %2723 = vmatpush3.msra.mxu0 %v3291_v52 }
 0x1d8   :  { %2724 = vmatprep.subr.mxu0 %v3037_v0 }
 0x1d9   :  { %2725 = vmatpush3.msra.mxu0 %v3297_v54 }
 0x1da   :  { %2726 = vmatprep.subr.mxu0 %v3037_v0 }
 0x1db   :  { %2727 = vmatpush3.msra.mxu0 %v3302_v55 }
 0x1dc   :  { %2728 = vmatprep.subr.mxu0 %v3037_v0 }
 0x1dd   :  { %2729 = vmatpush3.msra.mxu0 %v3307_v56 }
 0x1de   :  { %2731 = vmatmul.mubr.msk.f32.vlgmr.msra.gmra.mxu0 %vm58_vm1, %v3125_v13  ;;  %2751 = vmatprep.subr.mxu0 %v3037_v0 }
 0x1df   :  { %2733 = vmatprep.mubr.msk.f32.mxu0 %vm3038_vm0, %v3037_v0  ;;  %2752 = vmatpush3.msk.msra.mxu0 %vm592_vm4, %v3249_v39  ;;  %v25_v39 = vld [vmem:[%s3772_s2 + $0x10] sm:$0xff] }
 0x1e0   :  { %2774 = vmatprep.subr.mxu0 %v3037_v0 }
 0x1e2   :  { %2734 = vmatmul.mubr.msk.f32.gmra.mxu0 %vm58_vm1, %v3134_v14 }
 0x1e3   :  { %2736 = vmatprep.mubr.msk.f32.mxu0 %vm3038_vm0, %v3037_v0 }
 0x1e6   :  { %2737 = vmatmul.mubr.msk.f32.gmra.mxu0 %vm58_vm1, %v3144_v16 }
 0x1e7   :  { %2739 = vmatprep.mubr.msk.f32.mxu0 %vm3038_vm0, %v3037_v0 }
 0x1ea   :  { %2740 = vmatmul.mubr.msk.f32.gmra.mxu0 %vm58_vm1, %v3150_v17 }
 0x1eb   :  { %2742 = vmatprep.mubr.msk.f32.mxu0 %vm3038_vm0, %v3037_v0 }
 0x1ee   :  { %2743 = vmatmul.mubr.msk.f32.gmra.mxu0 %vm58_vm1, %v3159_v19 }
 0x1ef   :  { %2745 = vmatprep.mubr.msk.f32.mxu0 %vm3038_vm0, %v3037_v0 }
 0x1f2   :  { %2746 = vmatmul.mubr.msk.f32.gmra.mxu0 %vm58_vm1, %v3165_v20 }
 0x1f3   :  { %2748 = vmatprep.mubr.msk.f32.mxu0 %vm3038_vm0, %v3037_v0 }
 0x1f6   :  { %2749 = vmatmul.mubr.msk.f32.gmra.mxu0 %vm58_vm1, %v3174_v22 }
 0x1f7   :  { %2753 = vmatprep.mubr.msk.f32.mxu0 %vm3038_vm0, %v3037_v0 }
 0x29e   :  { %v536_v57 = vpop.f32.mrf.mxu0 }
 0x29f   :  { %2754 = vmatmul.mubr.msk.f32.vlgmr.msra.gmra.mxu0 %vm570_vm5, %v536_v57 }
 0x2a0   :  { %v2732_v58 = vpop.f32.mrf.mxu0  ;;  %2775 = vmatpush3.msk.msra.mxu0 %vm592_vm4, %v25_v39  ;;  %2776 = vmatprep.mubr.msk.f32.mxu0 %vm3038_vm0, %v3037_v0 }
 0x2a1   :  { %2832 = vmatprep.subr.mxu0 %v3037_v0 }
 0x2a2   :  { %v541_v59 = vpop.f32.mrf.mxu0 }
 0x2a3   :  { %2777 = vmatmul.mubr.msk.f32.vlgmr.msra.gmra.mxu0 %vm570_vm5, %v3307_v56  ;;  %2757 = vmatmul.mubr.msk.f32.vlgmr.msra.gmra.mxu1 %vm570_vm5, %v541_v59 }
 0x2a4   :  { %2779 = vmatprep.mubr.msk.f32.mxu0 %vm3038_vm0, %v3037_v0  ;;  %v2735_v60 = vpop.f32.mrf.mxu0  ;;  %2759 = vmatprep.mubr.msk.f32.mxu1 %vm3038_vm0, %v3037_v0 }
 0x2a5   :  { %2833 = vmatpush3.msk.msra.mxu0 %vm592_vm4, %v28_v10 }
 0x2a6   :  { %v546_v61 = vpop.f32.mrf.mxu0  ;;  %2878 = vmatprep.subr.mxu0 %v3037_v0 }
 0x2a7   :  { %2780 = vmatmul.mubr.msk.f32.gmra.mxu0 %vm570_vm5, %v3302_v55  ;;  %2760 = vmatmul.mubr.msk.f32.gmra.mxu1 %vm570_vm5, %v546_v61 }
 0x2a8   :  { %2782 = vmatprep.mubr.msk.f32.mxu0 %vm3038_vm0, %v3037_v0  ;;  %v2738_v63 = vpop.f32.mrf.mxu0  ;;  %2762 = vmatprep.mubr.msk.f32.mxu1 %vm3038_vm0, %v3037_v0 }
 0x2aa   :  { %v551_v1 = vpop.f32.mrf.mxu0 }
 0x2ab   :  { %2783 = vmatmul.mubr.msk.f32.gmra.mxu0 %vm570_vm5, %v3297_v54  ;;  %2763 = vmatmul.mubr.msk.f32.gmra.mxu1 %vm570_vm5, %v551_v1 }
 0x2ac   :  { %2785 = vmatprep.mubr.msk.f32.mxu0 %vm3038_vm0, %v3037_v0  ;;  %v2741_v2 = vpop.f32.mrf.mxu0  ;;  %2765 = vmatprep.mubr.msk.f32.mxu1 %vm3038_vm0, %v3037_v0 }
 0x2ae   :  { %v556_v4 = vpop.f32.mrf.mxu0 }
 0x2af   :  { %2786 = vmatmul.mubr.msk.f32.gmra.mxu0 %vm570_vm5, %v3291_v52  ;;  %2766 = vmatmul.mubr.msk.f32.gmra.mxu1 %vm570_vm5, %v556_v4 }
 0x2b0   :  { %2788 = vmatprep.mubr.msk.f32.mxu0 %vm3038_vm0, %v3037_v0  ;;  %v2744_v5 = vpop.f32.mrf.mxu0  ;;  %2768 = vmatprep.mubr.msk.f32.mxu1 %vm3038_vm0, %v3037_v0 }
 0x2b2   :  { %v561_v6 = vpop.f32.mrf.mxu0 }
 0x2b3   :  { %2789 = vmatmul.mubr.msk.f32.gmra.mxu0 %vm570_vm5, %v3285_v50  ;;  %2769 = vmatmul.mubr.msk.f32.gmra.mxu1 %vm570_vm5, %v561_v6 }
 0x2b4   :  { %2791 = vmatprep.mubr.msk.f32.mxu0 %vm3038_vm0, %v3037_v0  ;;  %v2747_v7 = vpop.f32.mrf.mxu0  ;;  %2771 = vmatprep.mubr.msk.f32.mxu1 %vm3038_vm0, %v3037_v0 }
 0x2b6   :  { %v566_v8 = vpop.f32.mrf.mxu0 }
 0x2b7   :  { %2792 = vmatmul.mubr.msk.f32.gmra.mxu0 %vm570_vm5, %v3279_v47  ;;  %2772 = vmatmul.mubr.msk.f32.gmra.mxu1 %vm570_vm5, %v566_v8 }
 0x2b8   :  { %2794 = vmatprep.mubr.msk.f32.mxu0 %vm3038_vm0, %v3037_v0  ;;  %v2750_v9 = vpop.f32.mrf.mxu0  ;;  %2811 = vmatprep.mubr.msk.f32.mxu1 %vm3038_vm0, %v3037_v0 }
 0x2bb   :  { %2795 = vmatmul.mubr.msk.f32.gmra.mxu0 %vm570_vm5, %v3275_v45 }
 0x2bc   :  { %2834 = vmatprep.mubr.msk.f32.mxu0 %vm3038_vm0, %v3037_v0 }
 0x35f   :  { %v662_v11 = vpop.f32.mrf.mxu0 }
 0x361   :  { %v2755_v12 = vpop.f32.mrf.mxu0 }
 0x363   :  { %v786_v15 = vpop.f32.mrf.mxu0  ;;  %v667_v18 = vpop.f32.mrf.mxu1 }
 0x364   :  { %v787_v6 = vadd.f32 %v786_v15, %v662_v11 }
 0x365   :  { %v2778_v21 = vpop.f32.mrf.mxu0  ;;  %v2758_v23 = vpop.f32.mrf.mxu1 }
 0x367   :  { %v791_v24 = vpop.f32.mrf.mxu0  ;;  %v672_v25 = vpop.f32.mrf.mxu1 }
 0x368   :  { %v792_v63 = vadd.f32 %v791_v24, %v667_v18  ;;  %v858_v18 = vmul.f32 0.7, %v3275_v45 }
 0x369   :  { %v2781_v26 = vpop.f32.mrf.mxu0  ;;  %v2761_v27 = vpop.f32.mrf.mxu1 }
 0x36a   :  { %v825_v10 = vadd.f32 %v823_v49, %v792_v63  ;;  %v824_v26 = vadd.f32 %v823_v49, %v787_v6 }
 0x36b   :  { %v796_v28 = vpop.f32.mrf.mxu0  ;;  %v677_v29 = vpop.f32.mrf.mxu1 }
 0x36c   :  { %v797_v58 = vadd.f32 %v796_v28, %v672_v25  ;;  %v832_v24 = vmax.f32 %v825_v10, 0.0 }
 0x36d   :  { %v2784_v31 = vpop.f32.mrf.mxu0  ;;  %v2764_v32 = vpop.f32.mrf.mxu1 }
 0x36e   :  { %v826_v7 = vadd.f32 %v823_v49, %v797_v58  ;;  %v857_v31 = vmul.f32 0.7, %v3279_v47  ;;  %v831_v32 = vmax.f32 %v824_v26, 0.0 }
 0x36f   :  { %v801_v33 = vpop.f32.mrf.mxu0  ;;  %v682_v34 = vpop.f32.mrf.mxu1 }
 0x370   :  { %v802_v51 = vadd.f32 %v801_v33, %v677_v29  ;;  %v833_v27 = vmax.f32 %v826_v7, 0.0  ;;  %v838_v47 = vmul.f32 %v831_v32, %v3266_v30 }
 0x371   :  { %v2787_v36 = vpop.f32.mrf.mxu0  ;;  %v2767_v37 = vpop.f32.mrf.mxu1 }
 0x372   :  { %v827_v1 = vadd.f32 %v823_v49, %v802_v51  ;;  %v840_v33 = vmul.f32 %v833_v27, %v3266_v30  ;;  %v839_v37 = vmul.f32 %v832_v24, %v3266_v30  ;;  %v2417_v27 = vld [vmem:[%s3774_s5 + $0x8] sm:$0x3f] }
 0x373   :  { %v806_v38 = vpop.f32.mrf.mxu0  ;;  %v687_v41 = vpop.f32.mrf.mxu1 }
 0x374   :  { %v807_v40 = vadd.f32 %v806_v38, %v682_v34  ;;  %v834_v12 = vmax.f32 %v827_v1, 0.0  ;;  %v847_v42 = vadd.f32 %v840_v33, %v3269_v35  ;;  %v1216_v33 = vsub.s32 2, %v3254_v62 }
 0x375   :  { %v2790_v43 = vpop.f32.mrf.mxu0  ;;  %v2770_v44 = vpop.f32.mrf.mxu1 }
 0x376   :  { %v828_v59 = vadd.f32 %v823_v49, %v807_v40  ;;  %v841_v29 = vmul.f32 %v834_v12, %v3266_v30  ;;  %v855_v44 = vmul.f32 0.7, %v3291_v52  ;;  %v846_v40 = vadd.f32 %v839_v37, %v3269_v35 }
 0x377   :  { %v811_v46 = vpop.f32.mrf.mxu0  ;;  %v692_v48 = vpop.f32.mrf.mxu1  ;;  %v853_v52 = vmul.f32 0.7, %v3302_v55  ;;  %v27_v55 = vld [vmem:[%s3772_s2 + $0x20] sm:$0xff] }
 0x378   :  { %v812_v53 = vadd.f32 %v811_v46, %v687_v41  ;;  %v835_v8 = vmax.f32 %v828_v59, 0.0  ;;  %v848_v45 = vadd.f32 %v841_v29, %v3269_v35  ;;  %v856_v41 = vmul.f32 0.7, %v3285_v50 }
 0x379   :  { %v2793_v39 = vpop.f32.mrf.mxu0  ;;  %v2773_v57 = vpop.f32.mrf.mxu1  ;;  %v854_v50 = vmul.f32 0.7, %v3297_v54  ;;  %v3444_v51 = vadd.f32 %v853_v52, %v846_v40 }
 0x37a   :  { %v829_v60 = vadd.f32 %v823_v49, %v812_v53  ;;  %v842_v25 = vmul.f32 %v835_v8, %v3266_v30  ;;  %v3433_v46 = vadd.f32 %v855_v44, %v848_v45  ;;  %v852_v53 = vmul.f32 0.7, %v3307_v56 }
 0x37b   :  { %v816_v61 = vpop.f32.mrf.mxu0 }
 0x37c   :  { %v836_v2 = vmax.f32 %v829_v60, 0.0  ;;  %v817_v4 = vadd.f32 %v816_v61, %v692_v48  ;;  %v849_v34 = vadd.f32 %v842_v25, %v3269_v35  ;;  %v845_v48 = vadd.f32 %v838_v47, %v3269_v35 }
 0x37d   :  { %v2796_v5 = vpop.f32.mrf.mxu0 }
 0x37e   :  { %v830_v9 = vadd.f32 %v823_v49, %v817_v4  ;;  %v843_v21 = vmul.f32 %v836_v2, %v3266_v30  ;;  %v3427_v43 = vadd.f32 %v856_v41, %v849_v34  ;;  %v3439_v49 = vadd.f32 %v854_v50, %v847_v42 }
 0x37f   :  { %v3449_v54 = vadd.f32 %v852_v53, %v845_v48  ;;  %v1217_v41 = vrot.slane %v3260_v3, %v1216_v33 }
 0x380   :  { %v837_v23 = vmax.f32 %v830_v9, 0.0  ;;  %v850_v11 = vadd.f32 %v843_v21, %v3269_v35 }
 0x382   :  { %v844_v28 = vmul.f32 %v837_v23, %v3266_v30  ;;  %v3420_v38 = vadd.f32 %v857_v31, %v850_v11 }
 0x384   :  { %v851_v15 = vadd.f32 %v844_v28, %v3269_v35 }
 0x386   :  { %v3415_v36 = vadd.f32 %v858_v18, %v851_v15 }
 0x388   :  { %2798 = vmatpush3.msra.mxu1 %v3415_v36 }
 0x389   :  { %2799 = vmatprep.subr.mxu1 %v3037_v0 }
 0x38a   :  { %2800 = vmatpush3.msra.mxu1 %v3420_v38 }
 0x38b   :  { %2801 = vmatprep.subr.mxu1 %v3037_v0 }
 0x38c   :  { %2802 = vmatpush3.msra.mxu1 %v3427_v43 }
 0x38d   :  { %2803 = vmatprep.subr.mxu1 %v3037_v0 }
 0x38e   :  { %2804 = vmatpush3.msra.mxu1 %v3433_v46 }
 0x38f   :  { %2805 = vmatprep.subr.mxu1 %v3037_v0 }
 0x390   :  { %2806 = vmatpush3.msra.mxu1 %v3439_v49 }
 0x391   :  { %2807 = vmatprep.subr.mxu1 %v3037_v0 }
 0x392   :  { %2808 = vmatpush3.msra.mxu1 %v3444_v51 }
 0x393   :  { %2809 = vmatprep.subr.mxu1 %v3037_v0 }
 0x394   :  { %2810 = vmatpush3.msra.mxu1 %v3449_v54 }
 0x395   :  { %2812 = vmatmul.mubr.msk.f32.vlgmr.msra.gmra.mxu1 %vm58_vm1, %v3125_v13  ;;  %2855 = vmatprep.subr.mxu1 %v3037_v0 }
 0x396   :  { %2814 = vmatprep.mubr.msk.f32.mxu1 %vm3038_vm0, %v3037_v0  ;;  %2856 = vmatpush3.msk.msra.mxu1 %vm592_vm4, %v27_v55 }
 0x397   :  { %2912 = vmatprep.subr.mxu1 %v3037_v0 }
 0x399   :  { %2815 = vmatmul.mubr.msk.f32.gmra.mxu1 %vm58_vm1, %v3134_v14 }
 0x39a   :  { %2817 = vmatprep.mubr.msk.f32.mxu1 %vm3038_vm0, %v3037_v0 }
 0x39d   :  { %2818 = vmatmul.mubr.msk.f32.gmra.mxu1 %vm58_vm1, %v3144_v16 }
 0x39e   :  { %2820 = vmatprep.mubr.msk.f32.mxu1 %vm3038_vm0, %v3037_v0 }
 0x3a1   :  { %2821 = vmatmul.mubr.msk.f32.gmra.mxu1 %vm58_vm1, %v3150_v17 }
 0x3a2   :  { %2823 = vmatprep.mubr.msk.f32.mxu1 %vm3038_vm0, %v3037_v0 }
 0x3a5   :  { %2824 = vmatmul.mubr.msk.f32.gmra.mxu1 %vm58_vm1, %v3159_v19 }
 0x3a6   :  { %2826 = vmatprep.mubr.msk.f32.mxu1 %vm3038_vm0, %v3037_v0 }
 0x3a9   :  { %2827 = vmatmul.mubr.msk.f32.gmra.mxu1 %vm58_vm1, %v3165_v20 }
 0x3aa   :  { %2829 = vmatprep.mubr.msk.f32.mxu1 %vm3038_vm0, %v3037_v0 }
 0x3ad   :  { %2830 = vmatmul.mubr.msk.f32.gmra.mxu1 %vm58_vm1, %v3174_v22 }
 0x3ae   :  { %2857 = vmatprep.mubr.msk.f32.mxu1 %vm3038_vm0, %v3037_v0 }
 0x3b1   :  { %2858 = vmatmul.mubr.msk.f32.vlgmr.msra.gmra.mxu1 %vm570_vm5, %v3449_v54 }
 0x3b2   :  { %2860 = vmatprep.mubr.msk.f32.mxu1 %vm3038_vm0, %v3037_v0  ;;  %2913 = vmatpush3.msk.msra.mxu1 %vm592_vm4, %v2417_v27  ;;  %v1249_v27 = vmul.f32 0.7, %v3433_v46 }
 0x3b3   :  { %2922 = vmatprep.subr.mxu1 %v3037_v0 }
 0x3b5   :  { %2861 = vmatmul.mubr.msk.f32.gmra.mxu1 %vm570_vm5, %v3444_v51 }
 0x3b6   :  { %2863 = vmatprep.mubr.msk.f32.mxu1 %vm3038_vm0, %v3037_v0 }
 0x3b9   :  { %2864 = vmatmul.mubr.msk.f32.gmra.mxu1 %vm570_vm5, %v3439_v49 }
 0x3ba   :  { %2866 = vmatprep.mubr.msk.f32.mxu1 %vm3038_vm0, %v3037_v0 }
 0x3bd   :  { %2867 = vmatmul.mubr.msk.f32.gmra.mxu1 %vm570_vm5, %v3433_v46  ;;  %v1247_v46 = vmul.f32 0.7, %v3444_v51  ;;  %v2415_v51 = vld [vmem:[%s3775_s4 + $0x8] sm:$0xff] }
 0x3be   :  { %2869 = vmatprep.mubr.msk.f32.mxu1 %vm3038_vm0, %v3037_v0 }
 0x3c1   :  { %2870 = vmatmul.mubr.msk.f32.gmra.mxu1 %vm570_vm5, %v3427_v43 }
 0x3c2   :  { %2872 = vmatprep.mubr.msk.f32.mxu1 %vm3038_vm0, %v3037_v0 }
 0x3c5   :  { %2873 = vmatmul.mubr.msk.f32.gmra.mxu1 %vm570_vm5, %v3420_v38 }
 0x3c6   :  { %2875 = vmatprep.mubr.msk.f32.mxu1 %vm3038_vm0, %v3037_v0 }
 0x3c9   :  { %2876 = vmatmul.mubr.msk.f32.gmra.mxu1 %vm570_vm5, %v3415_v36 }
 0x3ca   :  { %2914 = vmatprep.mubr.msk.f32.mxu1 %vm3038_vm0, %v3037_v0 }
 0x455   :  { %v932_v13 = vpop.f32.mrf.mxu1 }
 0x456   :  { %2835 = vmatmul.mubr.msk.f32.vlgmr.msra.gmra.mxu0 %vm570_vm5, %v932_v13 }
 0x457   :  { %v2813_v14 = vpop.f32.mrf.mxu1  ;;  %2837 = vmatprep.mubr.msk.f32.mxu0 %vm3038_vm0, %v3037_v0 }
 0x459   :  { %v937_v16 = vpop.f32.mrf.mxu1 }
 0x45a   :  { %2838 = vmatmul.mubr.msk.f32.gmra.mxu0 %vm570_vm5, %v937_v16 }
 0x45b   :  { %v2816_v17 = vpop.f32.mrf.mxu1  ;;  %2840 = vmatprep.mubr.msk.f32.mxu0 %vm3038_vm0, %v3037_v0 }
 0x45d   :  { %v942_v19 = vpop.f32.mrf.mxu1 }
 0x45e   :  { %2841 = vmatmul.mubr.msk.f32.gmra.mxu0 %vm570_vm5, %v942_v19 }
 0x45f   :  { %v2819_v20 = vpop.f32.mrf.mxu1  ;;  %2843 = vmatprep.mubr.msk.f32.mxu0 %vm3038_vm0, %v3037_v0 }
 0x461   :  { %v947_v22 = vpop.f32.mrf.mxu1 }
 0x462   :  { %2844 = vmatmul.mubr.msk.f32.gmra.mxu0 %vm570_vm5, %v947_v22 }
 0x463   :  { %v2822_v56 = vpop.f32.mrf.mxu1  ;;  %2846 = vmatprep.mubr.msk.f32.mxu0 %vm3038_vm0, %v3037_v0 }
 0x465   :  { %v952_v39 = vpop.f32.mrf.mxu1 }
 0x466   :  { %2847 = vmatmul.mubr.msk.f32.gmra.mxu0 %vm570_vm5, %v952_v39 }
 0x467   :  { %v2825_v57 = vpop.f32.mrf.mxu1  ;;  %2849 = vmatprep.mubr.msk.f32.mxu0 %vm3038_vm0, %v3037_v0 }
 0x469   :  { %v957_v58 = vpop.f32.mrf.mxu1 }
 0x46a   :  { %2850 = vmatmul.mubr.msk.f32.gmra.mxu0 %vm570_vm5, %v957_v58 }
 0x46b   :  { %v2828_v59 = vpop.f32.mrf.mxu1  ;;  %2852 = vmatprep.mubr.msk.f32.mxu0 %vm3038_vm0, %v3037_v0 }
 0x46d   :  { %v962_v60 = vpop.f32.mrf.mxu1 }
 0x46e   :  { %2853 = vmatmul.mubr.msk.f32.gmra.mxu0 %vm570_vm5, %v962_v60 }
 0x46f   :  { %v2831_v61 = vpop.f32.mrf.mxu1  ;;  %2892 = vmatprep.mubr.msk.f32.mxu0 %vm3038_vm0, %v3037_v0 }
 0x471   :  { %v1180_v63 = vpop.f32.mrf.mxu1 }
 0x473   :  { %v2859_v1 = vpop.f32.mrf.mxu1 }
 0x474   :  { %v1252_v1 = vmul.f32 0.7, %v3415_v36 }
 0x475   :  { %v1185_v2 = vpop.f32.mrf.mxu1 }
 0x477   :  { %v2862_v4 = vpop.f32.mrf.mxu1 }
 0x479   :  { %v1190_v5 = vpop.f32.mrf.mxu1 }
 0x47b   :  { %v2865_v6 = vpop.f32.mrf.mxu1 }
 0x47c   :  { %v1251_v6 = vmul.f32 0.7, %v3420_v38 }
 0x47d   :  { %v1195_v7 = vpop.f32.mrf.mxu1 }
 0x47f   :  { %v2868_v8 = vpop.f32.mrf.mxu1 }
 0x481   :  { %v1200_v9 = vpop.f32.mrf.mxu1 }
 0x483   :  { %v2871_v10 = vpop.f32.mrf.mxu1 }
 0x485   :  { %v1205_v12 = vpop.f32.mrf.mxu1 }
 0x487   :  { %v2874_v21 = vpop.f32.mrf.mxu1 }
 0x488   :  { %v1250_v21 = vmul.f32 0.7, %v3427_v43 }
 0x489   :  { %v1210_v23 = vpop.f32.mrf.mxu1 }
 0x48b   :  { %v2877_v26 = vpop.f32.mrf.mxu1 }
 0x516   :  { %v1056_v25 = vpop.f32.mrf.mxu0 }
 0x517   :  { %v1181_v17 = vadd.f32 %v1180_v63, %v1056_v25 }
 0x518   :  { %v2836_v28 = vpop.f32.mrf.mxu0 }
 0x519   :  { %v1218_v58 = vadd.f32 %v1217_v41, %v1181_v17  ;;  %v1248_v28 = vmul.f32 0.7, %v3439_v49  ;;  %v2432_v17 = vld [vmem:[%s3775_s4 + $0x20] sm:$0xff] }
 0x51a   :  { %v1061_v18 = vpop.f32.mrf.mxu0 }
 0x51b   :  { %v1186_v53 = vadd.f32 %v1185_v2, %v1061_v18 }
 0x51c   :  { %v2839_v24 = vpop.f32.mrf.mxu0 }
 0x51d   :  { %v1219_v56 = vadd.f32 %v1217_v41, %v1186_v53 }
 0x51e   :  { %v1066_v29 = vpop.f32.mrf.mxu0 }
 0x51f   :  { %v1191_v40 = vadd.f32 %v1190_v5, %v1066_v29  ;;  %v1226_v2 = vmax.f32 %v1219_v56, 0.0  ;;  %v1246_v29 = vmul.f32 0.7, %v3449_v54  ;;  %v1334_v54 = vld [vmem:[%s3774_s5] sm:$0x3f] }
 0x520   :  { %v2842_v11 = vpop.f32.mrf.mxu0 }
 0x521   :  { %v1220_v19 = vadd.f32 %v1217_v41, %v1191_v40 }
 0x522   :  { %v1071_v15 = vpop.f32.mrf.mxu0 }
 0x523   :  { %v1196_v47 = vadd.f32 %v1195_v7, %v1071_v15  ;;  %v1227_v59 = vmax.f32 %v1220_v19, 0.0  ;;  %v1225_v7 = vmax.f32 %v1218_v58, 0.0  ;;  %v2434_v19 = vld [vmem:[%s3774_s5 + $0x20] sm:$0x3f]  ;;  %v2439_v58 = vld [vmem:[%s3774_s5 + $0x28] sm:$0x3f] }
 0x524   :  { %v2845_v31 = vpop.f32.mrf.mxu0 }
 0x525   :  { %v1221_v55 = vadd.f32 %v1217_v41, %v1196_v47  ;;  %v1234_v8 = vmul.f32 %v1227_v59, %v3266_v30  ;;  %v1232_v38 = vmul.f32 %v1225_v7, %v3266_v30 }
 0x526   :  { %v1076_v32 = vpop.f32.mrf.mxu0 }
 0x527   :  { %v1201_v37 = vadd.f32 %v1200_v9, %v1076_v32  ;;  %v1228_v39 = vmax.f32 %v1221_v55, 0.0  ;;  %v1241_v26 = vadd.f32 %v1234_v8, %v3269_v35 }
 0x528   :  { %v2848_v34 = vpop.f32.mrf.mxu0 }
 0x529   :  { %v1222_v50 = vadd.f32 %v1217_v41, %v1201_v37  ;;  %v1235_v4 = vmul.f32 %v1228_v39, %v3266_v30  ;;  %v3577_v24 = vadd.f32 %v1248_v28, %v1241_v26  ;;  %v2422_v34 = vld [vmem:[%s3775_s4 + $0x10] sm:$0xff] }
 0x52a   :  { %v1081_v45 = vpop.f32.mrf.mxu0  ;;  %v2424_v37 = vld [vmem:[%s3774_s5 + $0x10] sm:$0x3f] }
 0x52b   :  { %v1206_v42 = vadd.f32 %v1205_v12, %v1081_v45  ;;  %v1229_v20 = vmax.f32 %v1222_v50, 0.0  ;;  %v1233_v12 = vmul.f32 %v1226_v2, %v3266_v30  ;;  %v1242_v36 = vadd.f32 %v1235_v4, %v3269_v35  ;;  %v2442_v4 = vld [vmem:[%s3775_s4 + $0x30] sm:$0xff] }
 0x52c   :  { %v2851_v44 = vpop.f32.mrf.mxu0 }
 0x52d   :  { %v1223_v48 = vadd.f32 %v1217_v41, %v1206_v42  ;;  %v1236_v60 = vmul.f32 %v1229_v20, %v3266_v30  ;;  %v1240_v43 = vadd.f32 %v1233_v12, %v3269_v35  ;;  %v3571_v18 = vadd.f32 %v1249_v27, %v1242_v36 }
 0x52e   :  { %v1086_v52 = vpop.f32.mrf.mxu0 }
 0x52f   :  { %v1230_v13 = vmax.f32 %v1223_v48, 0.0  ;;  %v1211_v14 = vadd.f32 %v1210_v23, %v1086_v52  ;;  %v1243_v9 = vadd.f32 %v1236_v60, %v3269_v35  ;;  %v3582_v11 = vadd.f32 %v1247_v46, %v1240_v43  ;;  %v2427_v48 = vld [vmem:[%s3775_s4 + $0x18] sm:$0xff] }
 0x530   :  { %v2854_v16 = vpop.f32.mrf.mxu0  ;;  %v2429_v52 = vld [vmem:[%s3774_s5 + $0x18] sm:$0x3f] }
 0x531   :  { %v1224_v22 = vadd.f32 %v1217_v41, %v1211_v14  ;;  %v1237_v3 = vmul.f32 %v1230_v13, %v3266_v30  ;;  %v3565_v25 = vadd.f32 %v1250_v21, %v1243_v9 }
 0x533   :  { %v1231_v57 = vmax.f32 %v1224_v22, 0.0  ;;  %v1244_v63 = vadd.f32 %v1237_v3, %v3269_v35 }
 0x535   :  { %v1238_v61 = vmul.f32 %v1231_v57, %v3266_v30  ;;  %v3558_v23 = vadd.f32 %v1251_v6, %v1244_v63  ;;  %v1239_v30 = vadd.f32 %v1232_v38, %v3269_v35  ;;  %v2437_v57 = vld [vmem:[%s3775_s4 + $0x28] sm:$0xff]  ;;  %v2444_v63 = vld [vmem:[%s3774_s5 + $0x30] sm:$0x3f] }
 0x537   :  { %v1245_v5 = vadd.f32 %v1238_v61, %v3269_v35  ;;  %v3586_v49 = vadd.f32 %v1246_v29, %v1239_v30  ;;  %v1260_v35 = vld [vmem:[%s3775_s4] sm:$0xff] }
 0x539   :  { %v3553_v10 = vadd.f32 %v1252_v1, %v1245_v5 }
 0x53b   :  { %2879 = vmatpush3.msra.mxu0 %v3553_v10 }
 0x53c   :  { %2880 = vmatprep.subr.mxu0 %v3037_v0 }
 0x53d   :  { %2881 = vmatpush3.msra.mxu0 %v3558_v23 }
 0x53e   :  { %2882 = vmatprep.subr.mxu0 %v3037_v0 }
 0x53f   :  { %2883 = vmatpush3.msra.mxu0 %v3565_v25 }
 0x540   :  { %2884 = vmatprep.subr.mxu0 %v3037_v0 }
 0x541   :  { %2885 = vmatpush3.msra.mxu0 %v3571_v18 }
 0x542   :  { %2886 = vmatprep.subr.mxu0 %v3037_v0 }
 0x543   :  { %2887 = vmatpush3.msra.mxu0 %v3577_v24 }
 0x544   :  { %2888 = vmatprep.subr.mxu0 %v3037_v0 }
 0x545   :  { %2889 = vmatpush3.msra.mxu0 %v3582_v11 }
 0x546   :  { %2890 = vmatprep.subr.mxu0 %v3037_v0 }
 0x547   :  { %2891 = vmatpush3.msra.mxu0 %v3586_v49 }
 0x548   :  { %2895 = vmatprep.subr.mxu0 %v3037_v0  ;;  %2893 = vmatmul.mubr.msk.f32.vlgmr.msra.gmra.mxu0 %vm58_vm1, %v1260_v35 }
 0x549   :  { %2896 = vmatpush3.msra.mxu0 %v3553_v10  ;;  %2909 = vmatprep.mubr.msk.f32.mxu0 %vm3038_vm0, %v3037_v0 }
 0x54a   :  { %2897 = vmatprep.subr.mxu0 %v3037_v0 }
 0x54b   :  { %2898 = vmatpush3.msra.mxu0 %v3558_v23 }
 0x54c   :  { %2899 = vmatprep.subr.mxu0 %v3037_v0 }
 0x54d   :  { %2900 = vmatpush3.msra.mxu0 %v3565_v25 }
 0x54e   :  { %2901 = vmatprep.subr.mxu0 %v3037_v0 }
 0x54f   :  { %2902 = vmatpush3.msra.mxu0 %v3571_v18 }
 0x550   :  { %2903 = vmatprep.subr.mxu0 %v3037_v0 }
 0x551   :  { %2904 = vmatpush3.msra.mxu0 %v3577_v24 }
 0x552   :  { %2905 = vmatprep.subr.mxu0 %v3037_v0 }
 0x553   :  { %2906 = vmatpush3.msra.mxu0 %v3582_v11 }
 0x554   :  { %2907 = vmatprep.subr.mxu0 %v3037_v0 }
 0x555   :  { %2908 = vmatpush3.msra.mxu0 %v3586_v49 }
 0x556   :  { %2910 = vmatmul.mubr.msk.f32.vlgmr.msra.gmra.mxu0 %vm58_vm1, %v2415_v51  ;;  %2917 = vmatprep.subr.mxu0 %v3037_v0 }
 0x557   :  { %2919 = vmatprep.mubr.msk.f32.mxu0 %vm3038_vm0, %v3037_v0  ;;  %2918 = vmatpush3.msk.msra.mxu0 %vm592_vm4, %v1334_v54 }
 0x558   :  { %2939 = vmatprep.subr.mxu0 %v3037_v0 }
 0x608   :  { %v1330_v15 = vpop.f32.mrf.mxu0 }
 0x609   :  { %2920 = vmatmul.mubr.msk.f32.vlgmr.msra.gmra.mxu0 %vm570_vm5, %v1330_v15 }
 0x60a   :  { %v2894_v31 = vpop.f32.mrf.mxu0  ;;  %2941 = vmatprep.mubr.msk.f32.mxu0 %vm3038_vm0, %v3037_v0  ;;  %2940 = vmatpush3.msk.msra.mxu0 %vm592_vm4, %v2424_v37 }
 0x60b   :  { %2944 = vmatprep.subr.mxu0 %v3037_v0 }
 0x616   :  { %v1406_v32 = vpop.f32.mrf.mxu0 }
 0x617   :  { %2915 = vmatmul.mubr.msk.f32.vlgmr.msra.gmra.mxu1 %vm570_vm5, %v1406_v32 }
 0x618   :  { %2923 = vmatpush3.msra.mxu1 %v3553_v10  ;;  %2936 = vmatprep.mubr.msk.f32.mxu1 %vm3038_vm0, %v3037_v0  ;;  %v2911_v33 = vpop.f32.mrf.mxu0 }
 0x619   :  { %2924 = vmatprep.subr.mxu1 %v3037_v0 }
 0x61a   :  { %2925 = vmatpush3.msra.mxu1 %v3558_v23 }
 0x61b   :  { %2926 = vmatprep.subr.mxu1 %v3037_v0 }
 0x61c   :  { %2927 = vmatpush3.msra.mxu1 %v3565_v25 }
 0x61d   :  { %2928 = vmatprep.subr.mxu1 %v3037_v0 }
 0x61e   :  { %2929 = vmatpush3.msra.mxu1 %v3571_v18 }
 0x61f   :  { %2930 = vmatprep.subr.mxu1 %v3037_v0 }
 0x620   :  { %2931 = vmatpush3.msra.mxu1 %v3577_v24 }
 0x621   :  { %2932 = vmatprep.subr.mxu1 %v3037_v0 }
 0x622   :  { %2933 = vmatpush3.msra.mxu1 %v3582_v11 }
 0x623   :  { %2934 = vmatprep.subr.mxu1 %v3037_v0 }
 0x624   :  { %2935 = vmatpush3.msra.mxu1 %v3586_v49 }
 0x625   :  { %2937 = vmatmul.mubr.msk.f32.vlgmr.msra.gmra.mxu1 %vm58_vm1, %v2422_v34  ;;  %2961 = vmatprep.subr.mxu1 %v3037_v0 }
 0x626   :  { %2963 = vmatprep.mubr.msk.f32.mxu1 %vm3038_vm0, %v3037_v0  ;;  %2962 = vmatpush3.msk.msra.mxu1 %vm592_vm4, %v2429_v52 }
 0x627   :  { %2966 = vmatprep.subr.mxu1 %v3037_v0 }
 0x6c9   :  { %v1560_v45 = vpop.f32.mrf.mxu0 }
 0x6cb   :  { %v2921_v41 = vpop.f32.mrf.mxu0 }
 0x6d7   :  { %v1484_v47 = vpop.f32.mrf.mxu1 }
 0x6d8   :  { %v1561_v42 = vadd.f32 %v1560_v45, %v1484_v47 }
 0x6d9   :  { %v2916_v44 = vpop.f32.mrf.mxu1 }
 0x6e5   :  { %v1635_v40 = vpop.f32.mrf.mxu1 }
 0x6e6   :  { %2942 = vmatmul.mubr.msk.f32.vlgmr.msra.gmra.mxu0 %vm570_vm5, %v1635_v40 }
 0x6e7   :  { %2945 = vmatpush3.msra.mxu0 %v3553_v10  ;;  %2958 = vmatprep.mubr.msk.f32.mxu0 %vm3038_vm0, %v3037_v0  ;;  %v2938_v50 = vpop.f32.mrf.mxu1 }
 0x6e8   :  { %2946 = vmatprep.subr.mxu0 %v3037_v0 }
 0x6e9   :  { %2947 = vmatpush3.msra.mxu0 %v3558_v23 }
 0x6ea   :  { %2948 = vmatprep.subr.mxu0 %v3037_v0 }
 0x6eb   :  { %2949 = vmatpush3.msra.mxu0 %v3565_v25 }
 0x6ec   :  { %2950 = vmatprep.subr.mxu0 %v3037_v0 }
 0x6ed   :  { %2951 = vmatpush3.msra.mxu0 %v3571_v18 }
 0x6ee   :  { %2952 = vmatprep.subr.mxu0 %v3037_v0 }
 0x6ef   :  { %2953 = vmatpush3.msra.mxu0 %v3577_v24 }
 0x6f0   :  { %2954 = vmatprep.subr.mxu0 %v3037_v0 }
 0x6f1   :  { %2955 = vmatpush3.msra.mxu0 %v3582_v11 }
 0x6f2   :  { %2956 = vmatprep.subr.mxu0 %v3037_v0 }
 0x6f3   :  { %2957 = vmatpush3.msra.mxu0 %v3586_v49 }
 0x6f4   :  { %2959 = vmatmul.mubr.msk.f32.vlgmr.msra.gmra.mxu0 %vm58_vm1, %v2427_v48  ;;  %2983 = vmatprep.subr.mxu0 %v3037_v0 }
 0x6f5   :  { %2985 = vmatprep.mubr.msk.f32.mxu0 %vm3038_vm0, %v3037_v0  ;;  %2984 = vmatpush3.msk.msra.mxu0 %vm592_vm4, %v2434_v19 }
 0x6f6   :  { %2988 = vmatprep.subr.mxu0 %v3037_v0 }
 0x7a6   :  { %v1713_v53 = vpop.f32.mrf.mxu0 }
 0x7a7   :  { %v1717_v55 = vadd.f32 %v1713_v53, %v1561_v42 }
 0x7a8   :  { %v2943_v13 = vpop.f32.mrf.mxu0 }
 0x7b4   :  { %v1789_v14 = vpop.f32.mrf.mxu0 }
 0x7b5   :  { %2964 = vmatmul.mubr.msk.f32.vlgmr.msra.gmra.mxu1 %vm570_vm5, %v1789_v14 }
 0x7b6   :  { %2967 = vmatpush3.msra.mxu1 %v3553_v10  ;;  %2980 = vmatprep.mubr.msk.f32.mxu1 %vm3038_vm0, %v3037_v0  ;;  %v2960_v16 = vpop.f32.mrf.mxu0 }
 0x7b7   :  { %2968 = vmatprep.subr.mxu1 %v3037_v0 }
 0x7b8   :  { %2969 = vmatpush3.msra.mxu1 %v3558_v23 }
 0x7b9   :  { %2970 = vmatprep.subr.mxu1 %v3037_v0 }
 0x7ba   :  { %2971 = vmatpush3.msra.mxu1 %v3565_v25 }
 0x7bb   :  { %2972 = vmatprep.subr.mxu1 %v3037_v0 }
 0x7bc   :  { %2973 = vmatpush3.msra.mxu1 %v3571_v18 }
 0x7bd   :  { %2974 = vmatprep.subr.mxu1 %v3037_v0 }
 0x7be   :  { %2975 = vmatpush3.msra.mxu1 %v3577_v24 }
 0x7bf   :  { %2976 = vmatprep.subr.mxu1 %v3037_v0 }
 0x7c0   :  { %2977 = vmatpush3.msra.mxu1 %v3582_v11 }
 0x7c1   :  { %2978 = vmatprep.subr.mxu1 %v3037_v0 }
 0x7c2   :  { %2979 = vmatpush3.msra.mxu1 %v3586_v49 }
 0x7c3   :  { %2981 = vmatmul.mubr.msk.f32.vlgmr.msra.gmra.mxu1 %vm58_vm1, %v2432_v17  ;;  %3005 = vmatprep.subr.mxu1 %v3037_v0 }
 0x7c4   :  { %3007 = vmatprep.mubr.msk.f32.mxu1 %vm3038_vm0, %v3037_v0  ;;  %3006 = vmatpush3.msk.msra.mxu1 %vm592_vm4, %v2439_v58 }
 0x7c5   :  { %3010 = vmatprep.subr.mxu1 %v3037_v0 }
 0x875   :  { %v1867_v20 = vpop.f32.mrf.mxu1 }
 0x876   :  { %v1871_v22 = vadd.f32 %v1867_v20, %v1717_v55 }
 0x877   :  { %v2965_v56 = vpop.f32.mrf.mxu1 }
 0x883   :  { %v1943_v39 = vpop.f32.mrf.mxu1 }
 0x884   :  { %2986 = vmatmul.mubr.msk.f32.vlgmr.msra.gmra.mxu0 %vm570_vm5, %v1943_v39 }
 0x885   :  { %2989 = vmatpush3.msra.mxu0 %v3553_v10  ;;  %3002 = vmatprep.mubr.msk.f32.mxu0 %vm3038_vm0, %v3037_v0  ;;  %v2982_v3 = vpop.f32.mrf.mxu1 }
 0x886   :  { %2990 = vmatprep.subr.mxu0 %v3037_v0 }
 0x887   :  { %2991 = vmatpush3.msra.mxu0 %v3558_v23 }
 0x888   :  { %2992 = vmatprep.subr.mxu0 %v3037_v0 }
 0x889   :  { %2993 = vmatpush3.msra.mxu0 %v3565_v25 }
 0x88a   :  { %2994 = vmatprep.subr.mxu0 %v3037_v0 }
 0x88b   :  { %2995 = vmatpush3.msra.mxu0 %v3571_v18 }
 0x88c   :  { %2996 = vmatprep.subr.mxu0 %v3037_v0 }
 0x88d   :  { %2997 = vmatpush3.msra.mxu0 %v3577_v24 }
 0x88e   :  { %2998 = vmatprep.subr.mxu0 %v3037_v0 }
 0x88f   :  { %2999 = vmatpush3.msra.mxu0 %v3582_v11 }
 0x890   :  { %3000 = vmatprep.subr.mxu0 %v3037_v0 }
 0x891   :  { %3001 = vmatpush3.msra.mxu0 %v3586_v49 }
 0x892   :  { %3003 = vmatmul.mubr.msk.f32.vlgmr.msra.gmra.mxu0 %vm58_vm1, %v2437_v57  ;;  %3027 = vmatprep.subr.mxu0 %v3037_v0 }
 0x893   :  { %3029 = vmatprep.mubr.msk.f32.mxu0 %vm3038_vm0, %v3037_v0  ;;  %3028 = vmatpush3.msk.msra.mxu0 %vm592_vm4, %v2444_v63 }
 0x944   :  { %v2021_v59 = vpop.f32.mrf.mxu0 }
 0x945   :  { %v2025_v60 = vadd.f32 %v2021_v59, %v1871_v22 }
 0x946   :  { %v2987_v61 = vpop.f32.mrf.mxu0 }
 0x952   :  { %v2097_v1 = vpop.f32.mrf.mxu0 }
 0x953   :  { %3008 = vmatmul.mubr.msk.f32.vlgmr.msra.gmra.mxu1 %vm570_vm5, %v2097_v1 }
 0x954   :  { %3011 = vmatpush3.msra.mxu1 %v3553_v10  ;;  %3024 = vmatprep.mubr.msk.f32.mxu1 %vm3038_vm0, %v3037_v0  ;;  %v3004_v2 = vpop.f32.mrf.mxu0  ;;  %v2336_v10 = vsub.s32 5, %v3254_v62 }
 0x955   :  { %3012 = vmatprep.subr.mxu1 %v3037_v0 }
 0x956   :  { %3013 = vmatpush3.msra.mxu1 %v3558_v23 }
 0x957   :  { %3014 = vmatprep.subr.mxu1 %v3037_v0 }
 0x958   :  { %3015 = vmatpush3.msra.mxu1 %v3565_v25 }
 0x959   :  { %3016 = vmatprep.subr.mxu1 %v3037_v0 }
 0x95a   :  { %3017 = vmatpush3.msra.mxu1 %v3571_v18 }
 0x95b   :  { %3018 = vmatprep.subr.mxu1 %v3037_v0 }
 0x95c   :  { %3019 = vmatpush3.msra.mxu1 %v3577_v24 }
 0x95d   :  { %3020 = vmatprep.subr.mxu1 %v3037_v0 }
 0x95e   :  { %3021 = vmatpush3.msra.mxu1 %v3582_v11 }
 0x95f   :  { %3022 = vmatprep.subr.mxu1 %v3037_v0  ;;  %v3036_v0 = vld [vmem:[%s3773_s3] sm:$0xff] }
 0x960   :  { %3023 = vmatpush3.msra.mxu1 %v3586_v49  ;;  %v2337_v12 = vrot.slane %v3036_v0, %v2336_v10 }
 0x961   :  { %3025 = vmatmul.mubr.msk.f32.vlgmr.msra.gmra.mxu1 %vm58_vm1, %v2442_v4 }
 0xa13   :  { %v2175_v5 = vpop.f32.mrf.mxu1 }
 0xa14   :  { %v2179_v6 = vadd.f32 %v2175_v5, %v2025_v60 }
 0xa15   :  { %v3009_v7 = vpop.f32.mrf.mxu1 }
 0xa21   :  { %v2251_v8 = vpop.f32.mrf.mxu1 }
 0xa22   :  { %3030 = vmatmul.mubr.msk.f32.vlgmr.msra.gmra.mxu0 %vm570_vm5, %v2251_v8 }
 0xa23   :  { %v3026_v9 = vpop.f32.mrf.mxu1 }
 0xae2   :  { %v2329_v36 = vpop.f32.mrf.mxu0 }
 0xae3   :  { %v2333_v21 = vadd.f32 %v2329_v36, %v2179_v6 }
 0xae4   :  { %v3031_v23 = vpop.f32.mrf.mxu0 }
 0xae5   :  { %v2338_v38 = vadd.f32 %v2337_v12, %v2333_v21 }
 0xae7   :  { %2340 = vst.msk [vmem:[%s3776_s6] sm:$0xff] %vm2339_vm6, %v2338_v38 }

</bundles_post_ra>
